<compile_context>
chip_gen: v6e
topology: v6e:2x2x1
jax: 0.10.0
libtpu: 0.0.40
codegen_flags: <defaults>
</compile_context>

<pallas_src>
import numpy as np
import jax
import jax.numpy as jnp
from jax.experimental import pallas as pl
from jax.experimental.pallas import tpu as pltpu


_LEVEL_KEYS = ('BCAT', 'AUX', 'SH', 'PR', 'PC', 'AH', 'AW')


# ----------------------------------------------------------------------------
# Host-side constant matrices (all boundary handling baked in at build time)
# ----------------------------------------------------------------------------
def _interp_matrix(n_out, n_in):
    """1-D linear interpolation matrix, F.interpolate(..., align_corners=True) semantics."""
    M = np.zeros((n_out, n_in), np.float32)
    idx = np.arange(n_out)
    if n_out == 1:
        src = np.zeros((n_out,), np.float64)
    else:
        src = idx * (n_in - 1) / (n_out - 1)
    p0 = np.clip(np.floor(src).astype(np.int64), 0, n_in - 1)
    p1 = np.clip(p0 + 1, 0, n_in - 1)
    frac = (src - p0).astype(np.float32)
    M[idx, p0] += (1.0 - frac)
    M[idx, p1] += frac
    return M


def _level_constants(Ro, C, P):
    """Constants for one recursion level whose *input* resolution is Ro x Ro, with P images
    packed along the row (sublane) axis.  Row-side matrices are block-diagonal over P."""
    Ri = Ro // 2
    eyeC = np.eye(C, dtype=np.float32)
    eyeP = np.eye(P, dtype=np.float32)
    ar = np.arange(Ri)
    # --- MaxPool2d(2,2) as paired even/odd selections + max (replaces SHV/LSH shifts) --------
    se = np.zeros((Ro, Ri), np.float32); se[2 * ar, ar] = 1.0          # even column blocks
    so = np.zeros((Ro, Ri), np.float32); so[2 * ar + 1, ar] = 1.0      # odd  column blocks
    pc = np.stack([np.kron(se, eyeC), np.kron(so, eyeC)], 0)           # (2, Ro*C, Ri*C)
    re = np.zeros((Ri, Ro), np.float32); re[ar, 2 * ar] = 1.0          # even rows
    ro = np.zeros((Ri, Ro), np.float32); ro[ar, 2 * ar + 1] = 1.0      # odd  rows
    pr = np.stack([np.kron(eyeP, re), np.kron(eyeP, ro)], 0)           # (2, P*Ri, P*Ro)
    # --- conv row-shift matrices at the inner (block) resolution, block-diag over P ----------
    sh = np.stack([np.kron(eyeP, np.eye(Ri, k=-1, dtype=np.float32)),  # row h -> x[h-1] (0 @ top)
                   np.kron(eyeP, np.eye(Ri, k=1, dtype=np.float32))],  # row h -> x[h+1] (0 @ bot)
                  0)                                                   # (2, P*Ri, P*Ri)
    # --- bilinear upsample Ri -> Ro (align_corners=True), separable --------------------------
    a = _interp_matrix(Ro, Ri)
    ah = np.kron(eyeP, a)                                              # (P*Ro, P*Ri) row interp
    aw = np.kron(a.T, eyeC).astype(np.float32)                         # (Ri*C, Ro*C) col interp
    return dict(PC=pc, PR=pr, SH=sh, AH=ah, AW=aw)


# ----------------------------------------------------------------------------
# Synthetic BottleneckIR parameters + folding into kernel form
# ----------------------------------------------------------------------------
def _init_bn(key, C):
    k1, k2, k3, k4 = jax.random.split(key, 4)
    gamma = 1.0 + 0.1 * jax.random.normal(k1, (C,), jnp.float32)
    beta = 0.1 * jax.random.normal(k2, (C,), jnp.float32)
    mean = 0.1 * jax.random.normal(k3, (C,), jnp.float32)
    var = jnp.abs(1.0 + 0.1 * jax.random.normal(k4, (C,), jnp.float32))
    scale = gamma / jnp.sqrt(var + 1e-5)
    shift = beta - mean * scale
    return np.asarray(scale), np.asarray(shift)


def _init_block_raw(key, C):
    """BottleneckIR(C, C, 1): BN -> conv3x3 -> BN -> PReLU -> conv3x3 -> BN, identity shortcut."""
    ks = jax.random.split(key, 6)
    s0, b0 = _init_bn(ks[0], C)
    w1 = np.asarray(0.1 * jax.random.normal(ks[1], (3, 3, C, C), jnp.float32))  # (kh,kw,ci,co)
    s1, b1 = _init_bn(ks[2], C)
    alpha = np.asarray(0.25 + 0.05 * jax.random.normal(ks[3], (C,), jnp.float32))
    w2 = np.asarray(0.1 * jax.random.normal(ks[4], (3, 3, C, C), jnp.float32))
    s2, b2 = _init_bn(ks[5], C)
    return dict(s0=s0, b0=b0, w1=w1, s1=s1, b1=b1, alpha=alpha, w2=w2, s2=s2, b2=b2)


def _band_matrices(weff, W, C):
    """Block-banded (W*C, W*C) matrices B[i]: 3x3 conv weights for kernel-row i, with the
    width-boundary zero padding baked in."""
    B = np.zeros((3, W * C, W * C), np.float32)
    for i in range(3):
        for j in range(3):
            for w in range(W):
                wp = w + j - 1
                if 0 <= wp < W:
                    B[i, wp * C:(wp + 1) * C, w * C:(w + 1) * C] = weff[i, j]
    return B


def _fold_block(raw, R, C, P):
    """Fold BN scales/shifts into conv weights + bias maps for a block at R x R resolution,
    with P images packed along rows.  Returns wide [B0|B1|B2] band matrices (one per conv)."""
    # BN0 scale -> conv1 input channels, BN1 scale -> conv1 output channels
    w1eff = raw['w1'] * raw['s0'][None, None, :, None] * raw['s1'][None, None, None, :]
    # BN2 scale -> conv2 output channels
    w2eff = raw['w2'] * raw['s2'][None, None, None, :]
    b1 = _band_matrices(w1eff, R, C)                                   # (3, R*C, R*C)
    b2 = _band_matrices(w2eff, R, C)
    bcat1 = np.concatenate([b1[0], b1[1], b1[2]], axis=1)              # (R*C, 3*R*C)
    bcat2 = np.concatenate([b2[0], b2[1], b2[2]], axis=1)
    bcat = np.stack([bcat1, bcat2], 0).astype(np.float32)              # (2, R*C, 3*R*C)
    # conv1 applied to the spatially constant BN0 shift (zero padding -> border dependent)
    contrib = np.einsum('ijab,a->ijb', raw['w1'], raw['b0'])           # (3,3,C)
    acc = np.zeros((R, R, C), np.float32)
    for i in range(3):
        h_lo, h_hi = max(0, 1 - i), min(R, R + 1 - i)
        for j in range(3):
            w_lo, w_hi = max(0, 1 - j), min(R, R + 1 - j)
            acc[h_lo:h_hi, w_lo:w_hi, :] += contrib[i, j]
    bias1 = (acc * raw['s1'][None, None, :] + raw['b1'][None, None, :]).reshape(R, R * C)
    bias1 = np.tile(bias1, (P, 1))                                     # (P*R, R*C)
    alpha = np.tile(raw['alpha'], (P * R, R)).astype(np.float32)       # (P*R, R*C)
    bias2 = np.tile(raw['b2'], (P * R, R)).astype(np.float32)          # (P*R, R*C)
    aux = np.stack([bias1.astype(np.float32), alpha, bias2], 0)        # (3, P*R, R*C)
    return bcat, aux


def init_mask_module_params(key, D, r, C, H, P):
    """Kernel-ready per-level constants for MaskModule(D, C, r, 'ir'), P images per grid step."""
    levels = []
    for L in range(D):
        Ro = H // (2 ** L)      # resolution entering this level
        Ri = Ro // 2            # resolution the level's blocks run at
        nb = (2 * r + 1) if L < D - 1 else r    # prev(r) [+ mid(1) + post(r)]
        bcats, auxs = [], []
        for _ in range(nb):
            key, bk = jax.random.split(key)
            raw = _init_block_raw(bk, C)
            bcat, aux = _fold_block(raw, Ri, C, P)
            bcats.append(bcat)
            auxs.append(aux)
        consts = _level_constants(Ro, C, P)
        levels.append(dict(
            # bf16 weights: native MXU operand dtype, halves constant VMEM/DMA footprint.
            BCAT=jnp.asarray(np.stack(bcats, 0), dtype=jnp.bfloat16),  # (nb, 2, Ri*C, 3*Ri*C)
            AUX=jnp.asarray(np.stack(auxs, 0), dtype=jnp.float32),     # (nb, 3, P*Ri, Ri*C) f32
            SH=jnp.asarray(consts['SH'], dtype=jnp.bfloat16),          # (2, P*Ri, P*Ri)
            PR=jnp.asarray(consts['PR'], dtype=jnp.bfloat16),          # (2, P*Ri, P*Ro)
            PC=jnp.asarray(consts['PC'], dtype=jnp.bfloat16),          # (2, Ro*C, Ri*C)
            AH=jnp.asarray(consts['AH'], dtype=jnp.bfloat16),          # (P*Ro, P*Ri)
            AW=jnp.asarray(consts['AW'], dtype=jnp.bfloat16),          # (Ri*C, Ro*C)
        ))
    return levels, key


# ----------------------------------------------------------------------------
# The fused kernel
# ----------------------------------------------------------------------------
def _make_kernel(D, r, inner_widths):
    n_per = len(_LEVEL_KEYS)

    def kernel(*refs):
        x_ref = refs[0]
        lvl = [dict(zip(_LEVEL_KEYS, refs[1 + n_per * L: 1 + n_per * (L + 1)]))
               for L in range(D)]
        o_ref = refs[1 + n_per * D]

        def mm(a, b):   # MXU: bf16 x bf16 operands, f32 accumulate
            return jnp.dot(a.astype(jnp.bfloat16), b.astype(jnp.bfloat16),
                           preferred_element_type=jnp.float32)

        def branch(h, L):                       # == MaskModule.mask_branch (traced statically)
            lv = lvl[L]
            RiC = inner_widths[L]
            # Per-level constants loaded ONCE (the block loops below are statically unrolled).
            sh0, sh2 = lv['SH'][0], lv['SH'][1]
            pre, pro = lv['PR'][0], lv['PR'][1]
            pce, pco = lv['PC'][0], lv['PC'][1]
            ah, aw = lv['AH'][...], lv['AW'][...]
            bcat_ref, aux_ref = lv['BCAT'], lv['AUX']

            def conv(t, bcat, bias):
                # 3x3 "same" conv: ONE wide matmul t@[B0|B1|B2], then block-diag row shifts on
                # the lane slices ((Sh@t)@B == Sh@(t@B)); width zero-padding is baked into B.
                wide = mm(t, bcat)                                  # (rows, 3*Ri*C)
                w0 = wide[:, 0:RiC]
                w1 = wide[:, RiC:2 * RiC]
                w2 = wide[:, 2 * RiC:3 * RiC]
                return mm(sh0, w0) + w1 + mm(sh2, w2) + bias

            def block(t, bi):
                # BottleneckIR (identity shortcut, stride 1); BN folded into weights/bias maps.
                u = conv(t, bcat_ref[bi, 0], aux_ref[bi, 0])        # BN0 -> conv1 -> BN1
                u = jnp.where(u >= 0.0, u, aux_ref[bi, 1] * u)      # PReLU (per channel), f32
                u = conv(u, bcat_ref[bi, 1], aux_ref[bi, 2])        # conv2 -> BN2
                return u + t                                        # residual add, f32

            # MaxPool2d(2,2): paired even/odd selection matmuls + VPU max
            # (no SHV/LSH shift matmuls; the two pushes at each stage are independent).
            z = jnp.maximum(mm(h, pce), mm(h, pco))                 # column pairs
            y = jnp.maximum(mm(pre, z), mm(pro, z))                 # row pairs

            for bi in range(r):
                y = block(y, bi)                                    # prev_res_layers[L]
            if L < D - 1:
                y = block(y, r)                                     # mid_res_layers[L]
                y = y + branch(y, L + 1)                            # shortcut + inner branch
                for bi in range(r):
                    y = block(y, r + 1 + bi)                        # post_res_layers[L]
            # bilinear upsample (align_corners=True), separable row/column interpolation
            return mm(ah, mm(y, aw))

        x = x_ref[0].astype(jnp.float32)        # (P*H, W*C), lane-dense, P images row-packed
        o_ref[0] = branch(x, 0).astype(o_ref.dtype)

    return kernel


def _const_index_map(ndim):
    return lambda g: (0,) * ndim


def mask_module_forward(x_nhwc, levels, r):
    """x_nhwc: (N, H, W, C) float32 -> (N, H, W, C)."""
    N, H, W, C = x_nhwc.shape
    D = len(levels)
    P = levels[0]['AH'].shape[0] // H          # packing factor baked into the constants
    assert N % P == 0, "batch must be divisible by the packing factor P"
    G = N // P
    inner_widths = tuple(int(lv['AW'].shape[0]) for lv in levels)   # Ri*C per level

    # (N,H,W,C) -> (N/P, P*H, W*C): lane-dense, P images packed along rows (free reshape).
    x2 = x_nhwc.reshape(G, P * H, W * C)

    args = [x2]
    in_specs = [pl.BlockSpec((1, P * H, W * C), lambda g: (g, 0, 0))]
    for lv in levels:
        for k in _LEVEL_KEYS:
            a = lv[k]
            args.append(a)
            in_specs.append(pl.BlockSpec(a.shape, _const_index_map(a.ndim)))

    out2 = pl.pallas_call(
        _make_kernel(D, r, inner_widths),
        out_shape=jax.ShapeDtypeStruct((G, P * H, W * C), x_nhwc.dtype),
        grid_spec=pltpu.PrefetchScalarGridSpec(
            num_scalar_prefetch=0,
            grid=(G,),
            in_specs=in_specs,
            out_specs=pl.BlockSpec((1, P * H, W * C), lambda g: (g, 0, 0)),
        ),
        compiler_params=pltpu.CompilerParams(dimension_semantics=("parallel",)),
    )(*args)
    return out2.reshape(N, H, W, C)


# ----------------------------------------------------------------------------
if __name__ == "__main__":
    key = jax.random.PRNGKey(0)
    N, C, H, W = 2, 8, 16, 16
    down_sample_times, r = 2, 1
    # Pack the whole (small) batch into one grid step: best for single-TC v5e/v6e.
    # On v7x (2 TensorCores) prefer P = N // 2 so the "parallel" grid has >= 2 steps.
    P = 2

    key, xk = jax.random.split(key)
    x_nchw = jax.random.normal(xk, (N, C, H, W), jnp.float32)   # PyTorch-style NCHW input
    x = jnp.transpose(x_nchw, (0, 2, 3, 1))                     # -> NHWC for the kernel

    levels, key = init_mask_module_params(key, down_sample_times, r, C, H, P)

    out = mask_module_forward(x, levels, r)
    out = jax.block_until_ready(out)
    assert out.shape == (N, H, W, C)
    assert bool(jnp.all(jnp.isfinite(out)))
    print("KERNEL_OK")
</pallas_src>

<mosaic_0001>
module attributes {stable_mosaic.version = 11 : i64} {
  func.func @kernel(%arg0: i32, %arg1: memref<1x32x128xf32, #tpu.memory_space<vmem>>, %arg2: memref<3x2x64x192xbf16, #tpu.memory_space<vmem>>, %arg3: memref<3x3x16x64xf32, #tpu.memory_space<vmem>>, %arg4: memref<2x16x16xbf16, #tpu.memory_space<vmem>>, %arg5: memref<2x16x32xbf16, #tpu.memory_space<vmem>>, %arg6: memref<2x128x64xbf16, #tpu.memory_space<vmem>>, %arg7: memref<32x16xbf16, #tpu.memory_space<vmem>>, %arg8: memref<64x128xbf16, #tpu.memory_space<vmem>>, %arg9: memref<1x2x32x96xbf16, #tpu.memory_space<vmem>>, %arg10: memref<1x3x8x32xf32, #tpu.memory_space<vmem>>, %arg11: memref<2x8x8xbf16, #tpu.memory_space<vmem>>, %arg12: memref<2x8x16xbf16, #tpu.memory_space<vmem>>, %arg13: memref<2x64x32xbf16, #tpu.memory_space<vmem>>, %arg14: memref<16x8xbf16, #tpu.memory_space<vmem>>, %arg15: memref<32x64xbf16, #tpu.memory_space<vmem>>, %arg16: memref<1x32x128xf32, #tpu.memory_space<vmem>>) attributes {dimension_semantics = [#tpu.dimension_semantics<parallel>], iteration_bounds = array<i64: 1>, scalar_prefetch = 0 : i64, scratch_operands = 0 : i64, tpu.core_type = #tpu.core_type<tc>, window_params = [{transform_indices = @transform_0, window_bounds = array<i64: 1, 32, 128>}, {pipeline_mode = #tpu.pipeline_mode<synchronous>, transform_indices = @transform_1, window_bounds = array<i64: 3, 2, 64, 192>}, {pipeline_mode = #tpu.pipeline_mode<synchronous>, transform_indices = @transform_2, window_bounds = array<i64: 3, 3, 16, 64>}, {pipeline_mode = #tpu.pipeline_mode<synchronous>, transform_indices = @transform_3, window_bounds = array<i64: 2, 16, 16>}, {pipeline_mode = #tpu.pipeline_mode<synchronous>, transform_indices = @transform_4, window_bounds = array<i64: 2, 16, 32>}, {pipeline_mode = #tpu.pipeline_mode<synchronous>, transform_indices = @transform_5, window_bounds = array<i64: 2, 128, 64>}, {pipeline_mode = #tpu.pipeline_mode<synchronous>, transform_indices = @transform_6, window_bounds = array<i64: 32, 16>}, {pipeline_mode = #tpu.pipeline_mode<synchronous>, transform_indices = @transform_7, window_bounds = array<i64: 64, 128>}, {pipeline_mode = #tpu.pipeline_mode<synchronous>, transform_indices = @transform_8, window_bounds = array<i64: 1, 2, 32, 96>}, {pipeline_mode = #tpu.pipeline_mode<synchronous>, transform_indices = @transform_9, window_bounds = array<i64: 1, 3, 8, 32>}, {pipeline_mode = #tpu.pipeline_mode<synchronous>, transform_indices = @transform_10, window_bounds = array<i64: 2, 8, 8>}, {pipeline_mode = #tpu.pipeline_mode<synchronous>, transform_indices = @transform_11, window_bounds = array<i64: 2, 8, 16>}, {pipeline_mode = #tpu.pipeline_mode<synchronous>, transform_indices = @transform_12, window_bounds = array<i64: 2, 64, 32>}, {pipeline_mode = #tpu.pipeline_mode<synchronous>, transform_indices = @transform_13, window_bounds = array<i64: 16, 8>}, {pipeline_mode = #tpu.pipeline_mode<synchronous>, transform_indices = @transform_14, window_bounds = array<i64: 32, 64>}, {transform_indices = @transform_15, window_bounds = array<i64: 1, 32, 128>}]} {
    %c0 = arith.constant 0 : index
    %c0_0 = arith.constant 0 : index
    %c0_1 = arith.constant 0 : index
    %0 = vector.load %arg1[%c0, %c0_0, %c0_1] : memref<1x32x128xf32, #tpu.memory_space<vmem>>, vector<1x32x128xf32>
    %1 = vector.shape_cast %0 : vector<1x32x128xf32> to vector<32x128xf32>
    %c0_2 = arith.constant 0 : index
    %c0_3 = arith.constant 0 : index
    %c0_4 = arith.constant 0 : index
    %2 = vector.load %arg4[%c0_2, %c0_3, %c0_4] : memref<2x16x16xbf16, #tpu.memory_space<vmem>>, vector<1x16x16xbf16>
    %3 = vector.shape_cast %2 : vector<1x16x16xbf16> to vector<16x16xbf16>
    %c1 = arith.constant 1 : index
    %c0_5 = arith.constant 0 : index
    %c0_6 = arith.constant 0 : index
    %4 = vector.load %arg4[%c1, %c0_5, %c0_6] : memref<2x16x16xbf16, #tpu.memory_space<vmem>>, vector<1x16x16xbf16>
    %5 = vector.shape_cast %4 : vector<1x16x16xbf16> to vector<16x16xbf16>
    %c0_7 = arith.constant 0 : index
    %c0_8 = arith.constant 0 : index
    %c0_9 = arith.constant 0 : index
    %6 = vector.load %arg5[%c0_7, %c0_8, %c0_9] : memref<2x16x32xbf16, #tpu.memory_space<vmem>>, vector<1x16x32xbf16>
    %7 = vector.shape_cast %6 : vector<1x16x32xbf16> to vector<16x32xbf16>
    %c1_10 = arith.constant 1 : index
    %c0_11 = arith.constant 0 : index
    %c0_12 = arith.constant 0 : index
    %8 = vector.load %arg5[%c1_10, %c0_11, %c0_12] : memref<2x16x32xbf16, #tpu.memory_space<vmem>>, vector<1x16x32xbf16>
    %9 = vector.shape_cast %8 : vector<1x16x32xbf16> to vector<16x32xbf16>
    %c0_13 = arith.constant 0 : index
    %c0_14 = arith.constant 0 : index
    %c0_15 = arith.constant 0 : index
    %10 = vector.load %arg6[%c0_13, %c0_14, %c0_15] : memref<2x128x64xbf16, #tpu.memory_space<vmem>>, vector<1x128x64xbf16>
    %11 = vector.shape_cast %10 : vector<1x128x64xbf16> to vector<128x64xbf16>
    %c1_16 = arith.constant 1 : index
    %c0_17 = arith.constant 0 : index
    %c0_18 = arith.constant 0 : index
    %12 = vector.load %arg6[%c1_16, %c0_17, %c0_18] : memref<2x128x64xbf16, #tpu.memory_space<vmem>>, vector<1x128x64xbf16>
    %13 = vector.shape_cast %12 : vector<1x128x64xbf16> to vector<128x64xbf16>
    %c0_19 = arith.constant 0 : index
    %c0_20 = arith.constant 0 : index
    %14 = vector.load %arg7[%c0_19, %c0_20] : memref<32x16xbf16, #tpu.memory_space<vmem>>, vector<32x16xbf16>
    %c0_21 = arith.constant 0 : index
    %c0_22 = arith.constant 0 : index
    %15 = vector.load %arg8[%c0_21, %c0_22] : memref<64x128xbf16, #tpu.memory_space<vmem>>, vector<64x128xbf16>
    %16 = arith.truncf %1 : vector<32x128xf32> to vector<32x128xbf16>
    %cst = arith.constant dense<0.000000e+00> : vector<32x64xf32>
    %17 = tpu.matmul %16, %11, %cst {dimension_numbers = #tpu.dot_dimension_numbers<[1], [0], [0], [1], [0, 0, 1, 1], [], []>} : vector<32x128xbf16>, vector<128x64xbf16>, vector<32x64xf32> -> vector<32x64xf32>
    %18 = arith.truncf %1 : vector<32x128xf32> to vector<32x128xbf16>
    %cst_23 = arith.constant dense<0.000000e+00> : vector<32x64xf32>
    %19 = tpu.matmul %18, %13, %cst_23 {dimension_numbers = #tpu.dot_dimension_numbers<[1], [0], [0], [1], [0, 0, 1, 1], [], []>} : vector<32x128xbf16>, vector<128x64xbf16>, vector<32x64xf32> -> vector<32x64xf32>
    %20 = arith.maximumf %17, %19 : vector<32x64xf32>
    %21 = arith.truncf %20 : vector<32x64xf32> to vector<32x64xbf16>
    %cst_24 = arith.constant dense<0.000000e+00> : vector<16x64xf32>
    %22 = tpu.matmul %7, %21, %cst_24 {dimension_numbers = #tpu.dot_dimension_numbers<[1], [0], [0], [1], [0, 0, 1, 1], [], []>} : vector<16x32xbf16>, vector<32x64xbf16>, vector<16x64xf32> -> vector<16x64xf32>
    %23 = arith.truncf %20 : vector<32x64xf32> to vector<32x64xbf16>
    %cst_25 = arith.constant dense<0.000000e+00> : vector<16x64xf32>
    %24 = tpu.matmul %9, %23, %cst_25 {dimension_numbers = #tpu.dot_dimension_numbers<[1], [0], [0], [1], [0, 0, 1, 1], [], []>} : vector<16x32xbf16>, vector<32x64xbf16>, vector<16x64xf32> -> vector<16x64xf32>
    %25 = arith.maximumf %22, %24 : vector<16x64xf32>
    %c0_26 = arith.constant 0 : index
    %c0_27 = arith.constant 0 : index
    %c0_28 = arith.constant 0 : index
    %c0_29 = arith.constant 0 : index
    %26 = vector.load %arg2[%c0_26, %c0_27, %c0_28, %c0_29] : memref<3x2x64x192xbf16, #tpu.memory_space<vmem>>, vector<1x1x64x192xbf16>
    %27 = vector.shape_cast %26 : vector<1x1x64x192xbf16> to vector<64x192xbf16>
    %c0_30 = arith.constant 0 : index
    %c0_31 = arith.constant 0 : index
    %c0_32 = arith.constant 0 : index
    %c0_33 = arith.constant 0 : index
    %28 = vector.load %arg3[%c0_30, %c0_31, %c0_32, %c0_33] : memref<3x3x16x64xf32, #tpu.memory_space<vmem>>, vector<1x1x16x64xf32>
    %29 = vector.shape_cast %28 : vector<1x1x16x64xf32> to vector<16x64xf32>
    %30 = arith.truncf %25 : vector<16x64xf32> to vector<16x64xbf16>
    %cst_34 = arith.constant dense<0.000000e+00> : vector<16x192xf32>
    %31 = tpu.matmul %30, %27, %cst_34 {dimension_numbers = #tpu.dot_dimension_numbers<[1], [0], [0], [1], [0, 0, 1, 1], [], []>} : vector<16x64xbf16>, vector<64x192xbf16>, vector<16x192xf32> -> vector<16x192xf32>
    %32 = vector.extract_strided_slice %31 {offsets = [0, 0], sizes = [16, 64], strides = [1, 1]} : vector<16x192xf32> to vector<16x64xf32>
    %33 = vector.extract_strided_slice %31 {offsets = [0, 64], sizes = [16, 64], strides = [1, 1]} : vector<16x192xf32> to vector<16x64xf32>
    %34 = vector.extract_strided_slice %31 {offsets = [0, 128], sizes = [16, 64], strides = [1, 1]} : vector<16x192xf32> to vector<16x64xf32>
    %35 = arith.truncf %32 : vector<16x64xf32> to vector<16x64xbf16>
    %cst_35 = arith.constant dense<0.000000e+00> : vector<16x64xf32>
    %36 = tpu.matmul %3, %35, %cst_35 {dimension_numbers = #tpu.dot_dimension_numbers<[1], [0], [0], [1], [0, 0, 1, 1], [], []>} : vector<16x16xbf16>, vector<16x64xbf16>, vector<16x64xf32> -> vector<16x64xf32>
    %37 = arith.addf %36, %33 : vector<16x64xf32>
    %38 = arith.truncf %34 : vector<16x64xf32> to vector<16x64xbf16>
    %cst_36 = arith.constant dense<0.000000e+00> : vector<16x64xf32>
    %39 = tpu.matmul %5, %38, %cst_36 {dimension_numbers = #tpu.dot_dimension_numbers<[1], [0], [0], [1], [0, 0, 1, 1], [], []>} : vector<16x16xbf16>, vector<16x64xbf16>, vector<16x64xf32> -> vector<16x64xf32>
    %40 = arith.addf %37, %39 : vector<16x64xf32>
    %41 = arith.addf %40, %29 : vector<16x64xf32>
    %cst_37 = arith.constant 0.000000e+00 : f32
    %42 = vector.broadcast %cst_37 : f32 to vector<16x64xf32>
    %43 = arith.cmpf oge, %41, %42 : vector<16x64xf32>
    %c0_38 = arith.constant 0 : index
    %c1_39 = arith.constant 1 : index
    %c0_40 = arith.constant 0 : index
    %c0_41 = arith.constant 0 : index
    %44 = vector.load %arg3[%c0_38, %c1_39, %c0_40, %c0_41] : memref<3x3x16x64xf32, #tpu.memory_space<vmem>>, vector<1x1x16x64xf32>
    %45 = vector.shape_cast %44 : vector<1x1x16x64xf32> to vector<16x64xf32>
    %46 = arith.mulf %45, %41 : vector<16x64xf32>
    %47 = arith.select %43, %41, %46 : vector<16x64xi1>, vector<16x64xf32>
    %c0_42 = arith.constant 0 : index
    %c1_43 = arith.constant 1 : index
    %c0_44 = arith.constant 0 : index
    %c0_45 = arith.constant 0 : index
    %48 = vector.load %arg2[%c0_42, %c1_43, %c0_44, %c0_45] : memref<3x2x64x192xbf16, #tpu.memory_space<vmem>>, vector<1x1x64x192xbf16>
    %49 = vector.shape_cast %48 : vector<1x1x64x192xbf16> to vector<64x192xbf16>
    %c0_46 = arith.constant 0 : index
    %c2 = arith.constant 2 : index
    %c0_47 = arith.constant 0 : index
    %c0_48 = arith.constant 0 : index
    %50 = vector.load %arg3[%c0_46, %c2, %c0_47, %c0_48] : memref<3x3x16x64xf32, #tpu.memory_space<vmem>>, vector<1x1x16x64xf32>
    %51 = vector.shape_cast %50 : vector<1x1x16x64xf32> to vector<16x64xf32>
    %52 = arith.truncf %47 : vector<16x64xf32> to vector<16x64xbf16>
    %cst_49 = arith.constant dense<0.000000e+00> : vector<16x192xf32>
    %53 = tpu.matmul %52, %49, %cst_49 {dimension_numbers = #tpu.dot_dimension_numbers<[1], [0], [0], [1], [0, 0, 1, 1], [], []>} : vector<16x64xbf16>, vector<64x192xbf16>, vector<16x192xf32> -> vector<16x192xf32>
    %54 = vector.extract_strided_slice %53 {offsets = [0, 0], sizes = [16, 64], strides = [1, 1]} : vector<16x192xf32> to vector<16x64xf32>
    %55 = vector.extract_strided_slice %53 {offsets = [0, 64], sizes = [16, 64], strides = [1, 1]} : vector<16x192xf32> to vector<16x64xf32>
    %56 = vector.extract_strided_slice %53 {offsets = [0, 128], sizes = [16, 64], strides = [1, 1]} : vector<16x192xf32> to vector<16x64xf32>
    %57 = arith.truncf %54 : vector<16x64xf32> to vector<16x64xbf16>
    %cst_50 = arith.constant dense<0.000000e+00> : vector<16x64xf32>
    %58 = tpu.matmul %3, %57, %cst_50 {dimension_numbers = #tpu.dot_dimension_numbers<[1], [0], [0], [1], [0, 0, 1, 1], [], []>} : vector<16x16xbf16>, vector<16x64xbf16>, vector<16x64xf32> -> vector<16x64xf32>
    %59 = arith.addf %58, %55 : vector<16x64xf32>
    %60 = arith.truncf %56 : vector<16x64xf32> to vector<16x64xbf16>
    %cst_51 = arith.constant dense<0.000000e+00> : vector<16x64xf32>
    %61 = tpu.matmul %5, %60, %cst_51 {dimension_numbers = #tpu.dot_dimension_numbers<[1], [0], [0], [1], [0, 0, 1, 1], [], []>} : vector<16x16xbf16>, vector<16x64xbf16>, vector<16x64xf32> -> vector<16x64xf32>
    %62 = arith.addf %59, %61 : vector<16x64xf32>
    %63 = arith.addf %62, %51 : vector<16x64xf32>
    %64 = arith.addf %63, %25 : vector<16x64xf32>
    %c1_52 = arith.constant 1 : index
    %c0_53 = arith.constant 0 : index
    %c0_54 = arith.constant 0 : index
    %c0_55 = arith.constant 0 : index
    %65 = vector.load %arg2[%c1_52, %c0_53, %c0_54, %c0_55] : memref<3x2x64x192xbf16, #tpu.memory_space<vmem>>, vector<1x1x64x192xbf16>
    %66 = vector.shape_cast %65 : vector<1x1x64x192xbf16> to vector<64x192xbf16>
    %c1_56 = arith.constant 1 : index
    %c0_57 = arith.constant 0 : index
    %c0_58 = arith.constant 0 : index
    %c0_59 = arith.constant 0 : index
    %67 = vector.load %arg3[%c1_56, %c0_57, %c0_58, %c0_59] : memref<3x3x16x64xf32, #tpu.memory_space<vmem>>, vector<1x1x16x64xf32>
    %68 = vector.shape_cast %67 : vector<1x1x16x64xf32> to vector<16x64xf32>
    %69 = arith.truncf %64 : vector<16x64xf32> to vector<16x64xbf16>
    %cst_60 = arith.constant dense<0.000000e+00> : vector<16x192xf32>
    %70 = tpu.matmul %69, %66, %cst_60 {dimension_numbers = #tpu.dot_dimension_numbers<[1], [0], [0], [1], [0, 0, 1, 1], [], []>} : vector<16x64xbf16>, vector<64x192xbf16>, vector<16x192xf32> -> vector<16x192xf32>
    %71 = vector.extract_strided_slice %70 {offsets = [0, 0], sizes = [16, 64], strides = [1, 1]} : vector<16x192xf32> to vector<16x64xf32>
    %72 = vector.extract_strided_slice %70 {offsets = [0, 64], sizes = [16, 64], strides = [1, 1]} : vector<16x192xf32> to vector<16x64xf32>
    %73 = vector.extract_strided_slice %70 {offsets = [0, 128], sizes = [16, 64], strides = [1, 1]} : vector<16x192xf32> to vector<16x64xf32>
    %74 = arith.truncf %71 : vector<16x64xf32> to vector<16x64xbf16>
    %cst_61 = arith.constant dense<0.000000e+00> : vector<16x64xf32>
    %75 = tpu.matmul %3, %74, %cst_61 {dimension_numbers = #tpu.dot_dimension_numbers<[1], [0], [0], [1], [0, 0, 1, 1], [], []>} : vector<16x16xbf16>, vector<16x64xbf16>, vector<16x64xf32> -> vector<16x64xf32>
    %76 = arith.addf %75, %72 : vector<16x64xf32>
    %77 = arith.truncf %73 : vector<16x64xf32> to vector<16x64xbf16>
    %cst_62 = arith.constant dense<0.000000e+00> : vector<16x64xf32>
    %78 = tpu.matmul %5, %77, %cst_62 {dimension_numbers = #tpu.dot_dimension_numbers<[1], [0], [0], [1], [0, 0, 1, 1], [], []>} : vector<16x16xbf16>, vector<16x64xbf16>, vector<16x64xf32> -> vector<16x64xf32>
    %79 = arith.addf %76, %78 : vector<16x64xf32>
    %80 = arith.addf %79, %68 : vector<16x64xf32>
    %cst_63 = arith.constant 0.000000e+00 : f32
    %81 = vector.broadcast %cst_63 : f32 to vector<16x64xf32>
    %82 = arith.cmpf oge, %80, %81 : vector<16x64xf32>
    %c1_64 = arith.constant 1 : index
    %c1_65 = arith.constant 1 : index
    %c0_66 = arith.constant 0 : index
    %c0_67 = arith.constant 0 : index
    %83 = vector.load %arg3[%c1_64, %c1_65, %c0_66, %c0_67] : memref<3x3x16x64xf32, #tpu.memory_space<vmem>>, vector<1x1x16x64xf32>
    %84 = vector.shape_cast %83 : vector<1x1x16x64xf32> to vector<16x64xf32>
    %85 = arith.mulf %84, %80 : vector<16x64xf32>
    %86 = arith.select %82, %80, %85 : vector<16x64xi1>, vector<16x64xf32>
    %c1_68 = arith.constant 1 : index
    %c1_69 = arith.constant 1 : index
    %c0_70 = arith.constant 0 : index
    %c0_71 = arith.constant 0 : index
    %87 = vector.load %arg2[%c1_68, %c1_69, %c0_70, %c0_71] : memref<3x2x64x192xbf16, #tpu.memory_space<vmem>>, vector<1x1x64x192xbf16>
    %88 = vector.shape_cast %87 : vector<1x1x64x192xbf16> to vector<64x192xbf16>
    %c1_72 = arith.constant 1 : index
    %c2_73 = arith.constant 2 : index
    %c0_74 = arith.constant 0 : index
    %c0_75 = arith.constant 0 : index
    %89 = vector.load %arg3[%c1_72, %c2_73, %c0_74, %c0_75] : memref<3x3x16x64xf32, #tpu.memory_space<vmem>>, vector<1x1x16x64xf32>
    %90 = vector.shape_cast %89 : vector<1x1x16x64xf32> to vector<16x64xf32>
    %91 = arith.truncf %86 : vector<16x64xf32> to vector<16x64xbf16>
    %cst_76 = arith.constant dense<0.000000e+00> : vector<16x192xf32>
    %92 = tpu.matmul %91, %88, %cst_76 {dimension_numbers = #tpu.dot_dimension_numbers<[1], [0], [0], [1], [0, 0, 1, 1], [], []>} : vector<16x64xbf16>, vector<64x192xbf16>, vector<16x192xf32> -> vector<16x192xf32>
    %93 = vector.extract_strided_slice %92 {offsets = [0, 0], sizes = [16, 64], strides = [1, 1]} : vector<16x192xf32> to vector<16x64xf32>
    %94 = vector.extract_strided_slice %92 {offsets = [0, 64], sizes = [16, 64], strides = [1, 1]} : vector<16x192xf32> to vector<16x64xf32>
    %95 = vector.extract_strided_slice %92 {offsets = [0, 128], sizes = [16, 64], strides = [1, 1]} : vector<16x192xf32> to vector<16x64xf32>
    %96 = arith.truncf %93 : vector<16x64xf32> to vector<16x64xbf16>
    %cst_77 = arith.constant dense<0.000000e+00> : vector<16x64xf32>
    %97 = tpu.matmul %3, %96, %cst_77 {dimension_numbers = #tpu.dot_dimension_numbers<[1], [0], [0], [1], [0, 0, 1, 1], [], []>} : vector<16x16xbf16>, vector<16x64xbf16>, vector<16x64xf32> -> vector<16x64xf32>
    %98 = arith.addf %97, %94 : vector<16x64xf32>
    %99 = arith.truncf %95 : vector<16x64xf32> to vector<16x64xbf16>
    %cst_78 = arith.constant dense<0.000000e+00> : vector<16x64xf32>
    %100 = tpu.matmul %5, %99, %cst_78 {dimension_numbers = #tpu.dot_dimension_numbers<[1], [0], [0], [1], [0, 0, 1, 1], [], []>} : vector<16x16xbf16>, vector<16x64xbf16>, vector<16x64xf32> -> vector<16x64xf32>
    %101 = arith.addf %98, %100 : vector<16x64xf32>
    %102 = arith.addf %101, %90 : vector<16x64xf32>
    %103 = arith.addf %102, %64 : vector<16x64xf32>
    %c0_79 = arith.constant 0 : index
    %c0_80 = arith.constant 0 : index
    %c0_81 = arith.constant 0 : index
    %104 = vector.load %arg11[%c0_79, %c0_80, %c0_81] : memref<2x8x8xbf16, #tpu.memory_space<vmem>>, vector<1x8x8xbf16>
    %105 = vector.shape_cast %104 : vector<1x8x8xbf16> to vector<8x8xbf16>
    %c1_82 = arith.constant 1 : index
    %c0_83 = arith.constant 0 : index
    %c0_84 = arith.constant 0 : index
    %106 = vector.load %arg11[%c1_82, %c0_83, %c0_84] : memref<2x8x8xbf16, #tpu.memory_space<vmem>>, vector<1x8x8xbf16>
    %107 = vector.shape_cast %106 : vector<1x8x8xbf16> to vector<8x8xbf16>
    %c0_85 = arith.constant 0 : index
    %c0_86 = arith.constant 0 : index
    %c0_87 = arith.constant 0 : index
    %108 = vector.load %arg12[%c0_85, %c0_86, %c0_87] : memref<2x8x16xbf16, #tpu.memory_space<vmem>>, vector<1x8x16xbf16>
    %109 = vector.shape_cast %108 : vector<1x8x16xbf16> to vector<8x16xbf16>
    %c1_88 = arith.constant 1 : index
    %c0_89 = arith.constant 0 : index
    %c0_90 = arith.constant 0 : index
    %110 = vector.load %arg12[%c1_88, %c0_89, %c0_90] : memref<2x8x16xbf16, #tpu.memory_space<vmem>>, vector<1x8x16xbf16>
    %111 = vector.shape_cast %110 : vector<1x8x16xbf16> to vector<8x16xbf16>
    %c0_91 = arith.constant 0 : index
    %c0_92 = arith.constant 0 : index
    %c0_93 = arith.constant 0 : index
    %112 = vector.load %arg13[%c0_91, %c0_92, %c0_93] : memref<2x64x32xbf16, #tpu.memory_space<vmem>>, vector<1x64x32xbf16>
    %113 = vector.shape_cast %112 : vector<1x64x32xbf16> to vector<64x32xbf16>
    %c1_94 = arith.constant 1 : index
    %c0_95 = arith.constant 0 : index
    %c0_96 = arith.constant 0 : index
    %114 = vector.load %arg13[%c1_94, %c0_95, %c0_96] : memref<2x64x32xbf16, #tpu.memory_space<vmem>>, vector<1x64x32xbf16>
    %115 = vector.shape_cast %114 : vector<1x64x32xbf16> to vector<64x32xbf16>
    %c0_97 = arith.constant 0 : index
    %c0_98 = arith.constant 0 : index
    %116 = vector.load %arg14[%c0_97, %c0_98] : memref<16x8xbf16, #tpu.memory_space<vmem>>, vector<16x8xbf16>
    %c0_99 = arith.constant 0 : index
    %c0_100 = arith.constant 0 : index
    %117 = vector.load %arg15[%c0_99, %c0_100] : memref<32x64xbf16, #tpu.memory_space<vmem>>, vector<32x64xbf16>
    %118 = arith.truncf %103 : vector<16x64xf32> to vector<16x64xbf16>
    %cst_101 = arith.constant dense<0.000000e+00> : vector<16x32xf32>
    %119 = tpu.matmul %118, %113, %cst_101 {dimension_numbers = #tpu.dot_dimension_numbers<[1], [0], [0], [1], [0, 0, 1, 1], [], []>} : vector<16x64xbf16>, vector<64x32xbf16>, vector<16x32xf32> -> vector<16x32xf32>
    %120 = arith.truncf %103 : vector<16x64xf32> to vector<16x64xbf16>
    %cst_102 = arith.constant dense<0.000000e+00> : vector<16x32xf32>
    %121 = tpu.matmul %120, %115, %cst_102 {dimension_numbers = #tpu.dot_dimension_numbers<[1], [0], [0], [1], [0, 0, 1, 1], [], []>} : vector<16x64xbf16>, vector<64x32xbf16>, vector<16x32xf32> -> vector<16x32xf32>
    %122 = arith.maximumf %119, %121 : vector<16x32xf32>
    %123 = arith.truncf %122 : vector<16x32xf32> to vector<16x32xbf16>
    %cst_103 = arith.constant dense<0.000000e+00> : vector<8x32xf32>
    %124 = tpu.matmul %109, %123, %cst_103 {dimension_numbers = #tpu.dot_dimension_numbers<[1], [0], [0], [1], [0, 0, 1, 1], [], []>} : vector<8x16xbf16>, vector<16x32xbf16>, vector<8x32xf32> -> vector<8x32xf32>
    %125 = arith.truncf %122 : vector<16x32xf32> to vector<16x32xbf16>
    %cst_104 = arith.constant dense<0.000000e+00> : vector<8x32xf32>
    %126 = tpu.matmul %111, %125, %cst_104 {dimension_numbers = #tpu.dot_dimension_numbers<[1], [0], [0], [1], [0, 0, 1, 1], [], []>} : vector<8x16xbf16>, vector<16x32xbf16>, vector<8x32xf32> -> vector<8x32xf32>
    %127 = arith.maximumf %124, %126 : vector<8x32xf32>
    %c0_105 = arith.constant 0 : index
    %c0_106 = arith.constant 0 : index
    %c0_107 = arith.constant 0 : index
    %c0_108 = arith.constant 0 : index
    %128 = vector.load %arg9[%c0_105, %c0_106, %c0_107, %c0_108] : memref<1x2x32x96xbf16, #tpu.memory_space<vmem>>, vector<1x1x32x96xbf16>
    %129 = vector.shape_cast %128 : vector<1x1x32x96xbf16> to vector<32x96xbf16>
    %c0_109 = arith.constant 0 : index
    %c0_110 = arith.constant 0 : index
    %c0_111 = arith.constant 0 : index
    %c0_112 = arith.constant 0 : index
    %130 = vector.load %arg10[%c0_109, %c0_110, %c0_111, %c0_112] : memref<1x3x8x32xf32, #tpu.memory_space<vmem>>, vector<1x1x8x32xf32>
    %131 = vector.shape_cast %130 : vector<1x1x8x32xf32> to vector<8x32xf32>
    %132 = arith.truncf %127 : vector<8x32xf32> to vector<8x32xbf16>
    %cst_113 = arith.constant dense<0.000000e+00> : vector<8x96xf32>
    %133 = tpu.matmul %132, %129, %cst_113 {dimension_numbers = #tpu.dot_dimension_numbers<[1], [0], [0], [1], [0, 0, 1, 1], [], []>} : vector<8x32xbf16>, vector<32x96xbf16>, vector<8x96xf32> -> vector<8x96xf32>
    %134 = vector.extract_strided_slice %133 {offsets = [0, 0], sizes = [8, 32], strides = [1, 1]} : vector<8x96xf32> to vector<8x32xf32>
    %135 = vector.extract_strided_slice %133 {offsets = [0, 32], sizes = [8, 32], strides = [1, 1]} : vector<8x96xf32> to vector<8x32xf32>
    %136 = vector.extract_strided_slice %133 {offsets = [0, 64], sizes = [8, 32], strides = [1, 1]} : vector<8x96xf32> to vector<8x32xf32>
    %137 = arith.truncf %134 : vector<8x32xf32> to vector<8x32xbf16>
    %cst_114 = arith.constant dense<0.000000e+00> : vector<8x32xf32>
    %138 = tpu.matmul %105, %137, %cst_114 {dimension_numbers = #tpu.dot_dimension_numbers<[1], [0], [0], [1], [0, 0, 1, 1], [], []>} : vector<8x8xbf16>, vector<8x32xbf16>, vector<8x32xf32> -> vector<8x32xf32>
    %139 = arith.addf %138, %135 : vector<8x32xf32>
    %140 = arith.truncf %136 : vector<8x32xf32> to vector<8x32xbf16>
    %cst_115 = arith.constant dense<0.000000e+00> : vector<8x32xf32>
    %141 = tpu.matmul %107, %140, %cst_115 {dimension_numbers = #tpu.dot_dimension_numbers<[1], [0], [0], [1], [0, 0, 1, 1], [], []>} : vector<8x8xbf16>, vector<8x32xbf16>, vector<8x32xf32> -> vector<8x32xf32>
    %142 = arith.addf %139, %141 : vector<8x32xf32>
    %143 = arith.addf %142, %131 : vector<8x32xf32>
    %cst_116 = arith.constant 0.000000e+00 : f32
    %144 = vector.broadcast %cst_116 : f32 to vector<8x32xf32>
    %145 = arith.cmpf oge, %143, %144 : vector<8x32xf32>
    %c0_117 = arith.constant 0 : index
    %c1_118 = arith.constant 1 : index
    %c0_119 = arith.constant 0 : index
    %c0_120 = arith.constant 0 : index
    %146 = vector.load %arg10[%c0_117, %c1_118, %c0_119, %c0_120] : memref<1x3x8x32xf32, #tpu.memory_space<vmem>>, vector<1x1x8x32xf32>
    %147 = vector.shape_cast %146 : vector<1x1x8x32xf32> to vector<8x32xf32>
    %148 = arith.mulf %147, %143 : vector<8x32xf32>
    %149 = arith.select %145, %143, %148 : vector<8x32xi1>, vector<8x32xf32>
    %c0_121 = arith.constant 0 : index
    %c1_122 = arith.constant 1 : index
    %c0_123 = arith.constant 0 : index
    %c0_124 = arith.constant 0 : index
    %150 = vector.load %arg9[%c0_121, %c1_122, %c0_123, %c0_124] : memref<1x2x32x96xbf16, #tpu.memory_space<vmem>>, vector<1x1x32x96xbf16>
    %151 = vector.shape_cast %150 : vector<1x1x32x96xbf16> to vector<32x96xbf16>
    %c0_125 = arith.constant 0 : index
    %c2_126 = arith.constant 2 : index
    %c0_127 = arith.constant 0 : index
    %c0_128 = arith.constant 0 : index
    %152 = vector.load %arg10[%c0_125, %c2_126, %c0_127, %c0_128] : memref<1x3x8x32xf32, #tpu.memory_space<vmem>>, vector<1x1x8x32xf32>
    %153 = vector.shape_cast %152 : vector<1x1x8x32xf32> to vector<8x32xf32>
    %154 = arith.truncf %149 : vector<8x32xf32> to vector<8x32xbf16>
    %cst_129 = arith.constant dense<0.000000e+00> : vector<8x96xf32>
    %155 = tpu.matmul %154, %151, %cst_129 {dimension_numbers = #tpu.dot_dimension_numbers<[1], [0], [0], [1], [0, 0, 1, 1], [], []>} : vector<8x32xbf16>, vector<32x96xbf16>, vector<8x96xf32> -> vector<8x96xf32>
    %156 = vector.extract_strided_slice %155 {offsets = [0, 0], sizes = [8, 32], strides = [1, 1]} : vector<8x96xf32> to vector<8x32xf32>
    %157 = vector.extract_strided_slice %155 {offsets = [0, 32], sizes = [8, 32], strides = [1, 1]} : vector<8x96xf32> to vector<8x32xf32>
    %158 = vector.extract_strided_slice %155 {offsets = [0, 64], sizes = [8, 32], strides = [1, 1]} : vector<8x96xf32> to vector<8x32xf32>
    %159 = arith.truncf %156 : vector<8x32xf32> to vector<8x32xbf16>
    %cst_130 = arith.constant dense<0.000000e+00> : vector<8x32xf32>
    %160 = tpu.matmul %105, %159, %cst_130 {dimension_numbers = #tpu.dot_dimension_numbers<[1], [0], [0], [1], [0, 0, 1, 1], [], []>} : vector<8x8xbf16>, vector<8x32xbf16>, vector<8x32xf32> -> vector<8x32xf32>
    %161 = arith.addf %160, %157 : vector<8x32xf32>
    %162 = arith.truncf %158 : vector<8x32xf32> to vector<8x32xbf16>
    %cst_131 = arith.constant dense<0.000000e+00> : vector<8x32xf32>
    %163 = tpu.matmul %107, %162, %cst_131 {dimension_numbers = #tpu.dot_dimension_numbers<[1], [0], [0], [1], [0, 0, 1, 1], [], []>} : vector<8x8xbf16>, vector<8x32xbf16>, vector<8x32xf32> -> vector<8x32xf32>
    %164 = arith.addf %161, %163 : vector<8x32xf32>
    %165 = arith.addf %164, %153 : vector<8x32xf32>
    %166 = arith.addf %165, %127 : vector<8x32xf32>
    %167 = arith.truncf %166 : vector<8x32xf32> to vector<8x32xbf16>
    %cst_132 = arith.constant dense<0.000000e+00> : vector<8x64xf32>
    %168 = tpu.matmul %167, %117, %cst_132 {dimension_numbers = #tpu.dot_dimension_numbers<[1], [0], [0], [1], [0, 0, 1, 1], [], []>} : vector<8x32xbf16>, vector<32x64xbf16>, vector<8x64xf32> -> vector<8x64xf32>
    %169 = arith.truncf %168 : vector<8x64xf32> to vector<8x64xbf16>
    %cst_133 = arith.constant dense<0.000000e+00> : vector<16x64xf32>
    %170 = tpu.matmul %116, %169, %cst_133 {dimension_numbers = #tpu.dot_dimension_numbers<[1], [0], [0], [1], [0, 0, 1, 1], [], []>} : vector<16x8xbf16>, vector<8x64xbf16>, vector<16x64xf32> -> vector<16x64xf32>
    %171 = arith.addf %103, %170 : vector<16x64xf32>
    %c2_134 = arith.constant 2 : index
    %c0_135 = arith.constant 0 : index
    %c0_136 = arith.constant 0 : index
    %c0_137 = arith.constant 0 : index
    %172 = vector.load %arg2[%c2_134, %c0_135, %c0_136, %c0_137] : memref<3x2x64x192xbf16, #tpu.memory_space<vmem>>, vector<1x1x64x192xbf16>
    %173 = vector.shape_cast %172 : vector<1x1x64x192xbf16> to vector<64x192xbf16>
    %c2_138 = arith.constant 2 : index
    %c0_139 = arith.constant 0 : index
    %c0_140 = arith.constant 0 : index
    %c0_141 = arith.constant 0 : index
    %174 = vector.load %arg3[%c2_138, %c0_139, %c0_140, %c0_141] : memref<3x3x16x64xf32, #tpu.memory_space<vmem>>, vector<1x1x16x64xf32>
    %175 = vector.shape_cast %174 : vector<1x1x16x64xf32> to vector<16x64xf32>
    %176 = arith.truncf %171 : vector<16x64xf32> to vector<16x64xbf16>
    %cst_142 = arith.constant dense<0.000000e+00> : vector<16x192xf32>
    %177 = tpu.matmul %176, %173, %cst_142 {dimension_numbers = #tpu.dot_dimension_numbers<[1], [0], [0], [1], [0, 0, 1, 1], [], []>} : vector<16x64xbf16>, vector<64x192xbf16>, vector<16x192xf32> -> vector<16x192xf32>
    %178 = vector.extract_strided_slice %177 {offsets = [0, 0], sizes = [16, 64], strides = [1, 1]} : vector<16x192xf32> to vector<16x64xf32>
    %179 = vector.extract_strided_slice %177 {offsets = [0, 64], sizes = [16, 64], strides = [1, 1]} : vector<16x192xf32> to vector<16x64xf32>
    %180 = vector.extract_strided_slice %177 {offsets = [0, 128], sizes = [16, 64], strides = [1, 1]} : vector<16x192xf32> to vector<16x64xf32>
    %181 = arith.truncf %178 : vector<16x64xf32> to vector<16x64xbf16>
    %cst_143 = arith.constant dense<0.000000e+00> : vector<16x64xf32>
    %182 = tpu.matmul %3, %181, %cst_143 {dimension_numbers = #tpu.dot_dimension_numbers<[1], [0], [0], [1], [0, 0, 1, 1], [], []>} : vector<16x16xbf16>, vector<16x64xbf16>, vector<16x64xf32> -> vector<16x64xf32>
    %183 = arith.addf %182, %179 : vector<16x64xf32>
    %184 = arith.truncf %180 : vector<16x64xf32> to vector<16x64xbf16>
    %cst_144 = arith.constant dense<0.000000e+00> : vector<16x64xf32>
    %185 = tpu.matmul %5, %184, %cst_144 {dimension_numbers = #tpu.dot_dimension_numbers<[1], [0], [0], [1], [0, 0, 1, 1], [], []>} : vector<16x16xbf16>, vector<16x64xbf16>, vector<16x64xf32> -> vector<16x64xf32>
    %186 = arith.addf %183, %185 : vector<16x64xf32>
    %187 = arith.addf %186, %175 : vector<16x64xf32>
    %cst_145 = arith.constant 0.000000e+00 : f32
    %188 = vector.broadcast %cst_145 : f32 to vector<16x64xf32>
    %189 = arith.cmpf oge, %187, %188 : vector<16x64xf32>
    %c2_146 = arith.constant 2 : index
    %c1_147 = arith.constant 1 : index
    %c0_148 = arith.constant 0 : index
    %c0_149 = arith.constant 0 : index
    %190 = vector.load %arg3[%c2_146, %c1_147, %c0_148, %c0_149] : memref<3x3x16x64xf32, #tpu.memory_space<vmem>>, vector<1x1x16x64xf32>
    %191 = vector.shape_cast %190 : vector<1x1x16x64xf32> to vector<16x64xf32>
    %192 = arith.mulf %191, %187 : vector<16x64xf32>
    %193 = arith.select %189, %187, %192 : vector<16x64xi1>, vector<16x64xf32>
    %c2_150 = arith.constant 2 : index
    %c1_151 = arith.constant 1 : index
    %c0_152 = arith.constant 0 : index
    %c0_153 = arith.constant 0 : index
    %194 = vector.load %arg2[%c2_150, %c1_151, %c0_152, %c0_153] : memref<3x2x64x192xbf16, #tpu.memory_space<vmem>>, vector<1x1x64x192xbf16>
    %195 = vector.shape_cast %194 : vector<1x1x64x192xbf16> to vector<64x192xbf16>
    %c2_154 = arith.constant 2 : index
    %c2_155 = arith.constant 2 : index
    %c0_156 = arith.constant 0 : index
    %c0_157 = arith.constant 0 : index
    %196 = vector.load %arg3[%c2_154, %c2_155, %c0_156, %c0_157] : memref<3x3x16x64xf32, #tpu.memory_space<vmem>>, vector<1x1x16x64xf32>
    %197 = vector.shape_cast %196 : vector<1x1x16x64xf32> to vector<16x64xf32>
    %198 = arith.truncf %193 : vector<16x64xf32> to vector<16x64xbf16>
    %cst_158 = arith.constant dense<0.000000e+00> : vector<16x192xf32>
    %199 = tpu.matmul %198, %195, %cst_158 {dimension_numbers = #tpu.dot_dimension_numbers<[1], [0], [0], [1], [0, 0, 1, 1], [], []>} : vector<16x64xbf16>, vector<64x192xbf16>, vector<16x192xf32> -> vector<16x192xf32>
    %200 = vector.extract_strided_slice %199 {offsets = [0, 0], sizes = [16, 64], strides = [1, 1]} : vector<16x192xf32> to vector<16x64xf32>
    %201 = vector.extract_strided_slice %199 {offsets = [0, 64], sizes = [16, 64], strides = [1, 1]} : vector<16x192xf32> to vector<16x64xf32>
    %202 = vector.extract_strided_slice %199 {offsets = [0, 128], sizes = [16, 64], strides = [1, 1]} : vector<16x192xf32> to vector<16x64xf32>
    %203 = arith.truncf %200 : vector<16x64xf32> to vector<16x64xbf16>
    %cst_159 = arith.constant dense<0.000000e+00> : vector<16x64xf32>
    %204 = tpu.matmul %3, %203, %cst_159 {dimension_numbers = #tpu.dot_dimension_numbers<[1], [0], [0], [1], [0, 0, 1, 1], [], []>} : vector<16x16xbf16>, vector<16x64xbf16>, vector<16x64xf32> -> vector<16x64xf32>
    %205 = arith.addf %204, %201 : vector<16x64xf32>
    %206 = arith.truncf %202 : vector<16x64xf32> to vector<16x64xbf16>
    %cst_160 = arith.constant dense<0.000000e+00> : vector<16x64xf32>
    %207 = tpu.matmul %5, %206, %cst_160 {dimension_numbers = #tpu.dot_dimension_numbers<[1], [0], [0], [1], [0, 0, 1, 1], [], []>} : vector<16x16xbf16>, vector<16x64xbf16>, vector<16x64xf32> -> vector<16x64xf32>
    %208 = arith.addf %205, %207 : vector<16x64xf32>
    %209 = arith.addf %208, %197 : vector<16x64xf32>
    %210 = arith.addf %209, %171 : vector<16x64xf32>
    %211 = arith.truncf %210 : vector<16x64xf32> to vector<16x64xbf16>
    %cst_161 = arith.constant dense<0.000000e+00> : vector<16x128xf32>
    %212 = tpu.matmul %211, %15, %cst_161 {dimension_numbers = #tpu.dot_dimension_numbers<[1], [0], [0], [1], [0, 0, 1, 1], [], []>} : vector<16x64xbf16>, vector<64x128xbf16>, vector<16x128xf32> -> vector<16x128xf32>
    %213 = arith.truncf %212 : vector<16x128xf32> to vector<16x128xbf16>
    %cst_162 = arith.constant dense<0.000000e+00> : vector<32x128xf32>
    %214 = tpu.matmul %14, %213, %cst_162 {dimension_numbers = #tpu.dot_dimension_numbers<[1], [0], [0], [1], [0, 0, 1, 1], [], []>} : vector<32x16xbf16>, vector<16x128xbf16>, vector<32x128xf32> -> vector<32x128xf32>
    %c0_163 = arith.constant 0 : index
    %c0_164 = arith.constant 0 : index
    %c0_165 = arith.constant 0 : index
    %215 = vector.load %arg16[%c0_163, %c0_164, %c0_165] : memref<1x32x128xf32, #tpu.memory_space<vmem>>, vector<1x32x128xf32>
    %216 = vector.shape_cast %215 : vector<1x32x128xf32> to vector<32x128xf32>
    %217 = vector.shape_cast %214 : vector<32x128xf32> to vector<1x32x128xf32>
    tpu.vector_store %arg16[%c0_163, %c0_164, %c0_165], %217 {strides = array<i32>} : memref<1x32x128xf32, #tpu.memory_space<vmem>>, vector<1x32x128xf32>,
    return
  }
  func.func @transform_0(%arg0: i32) -> (i32, i32, i32) {
    %c0_i32 = arith.constant 0 : i32
    %c0_i32_0 = arith.constant 0 : i32
    %c0_i32_1 = arith.constant 0 : i32
    return %arg0, %c0_i32, %c0_i32_0 : i32, i32, i32
  }
  func.func @transform_1(%arg0: i32) -> (i32, i32, i32, i32) {
    %c0_i32 = arith.constant 0 : i32
    %c0_i32_0 = arith.constant 0 : i32
    %c0_i32_1 = arith.constant 0 : i32
    %c0_i32_2 = arith.constant 0 : i32
    %c0_i32_3 = arith.constant 0 : i32
    return %c0_i32, %c0_i32_0, %c0_i32_1, %c0_i32_2 : i32, i32, i32, i32
  }
  func.func @transform_2(%arg0: i32) -> (i32, i32, i32, i32) {
    %c0_i32 = arith.constant 0 : i32
    %c0_i32_0 = arith.constant 0 : i32
    %c0_i32_1 = arith.constant 0 : i32
    %c0_i32_2 = arith.constant 0 : i32
    %c0_i32_3 = arith.constant 0 : i32
    return %c0_i32, %c0_i32_0, %c0_i32_1, %c0_i32_2 : i32, i32, i32, i32
  }
  func.func @transform_3(%arg0: i32) -> (i32, i32, i32) {
    %c0_i32 = arith.constant 0 : i32
    %c0_i32_0 = arith.constant 0 : i32
    %c0_i32_1 = arith.constant 0 : i32
    %c0_i32_2 = arith.constant 0 : i32
    return %c0_i32, %c0_i32_0, %c0_i32_1 : i32, i32, i32
  }
  func.func @transform_4(%arg0: i32) -> (i32, i32, i32) {
    %c0_i32 = arith.constant 0 : i32
    %c0_i32_0 = arith.constant 0 : i32
    %c0_i32_1 = arith.constant 0 : i32
    %c0_i32_2 = arith.constant 0 : i32
    return %c0_i32, %c0_i32_0, %c0_i32_1 : i32, i32, i32
  }
  func.func @transform_5(%arg0: i32) -> (i32, i32, i32) {
    %c0_i32 = arith.constant 0 : i32
    %c0_i32_0 = arith.constant 0 : i32
    %c0_i32_1 = arith.constant 0 : i32
    %c0_i32_2 = arith.constant 0 : i32
    return %c0_i32, %c0_i32_0, %c0_i32_1 : i32, i32, i32
  }
  func.func @transform_6(%arg0: i32) -> (i32, i32) {
    %c0_i32 = arith.constant 0 : i32
    %c0_i32_0 = arith.constant 0 : i32
    %c0_i32_1 = arith.constant 0 : i32
    return %c0_i32, %c0_i32_0 : i32, i32
  }
  func.func @transform_7(%arg0: i32) -> (i32, i32) {
    %c0_i32 = arith.constant 0 : i32
    %c0_i32_0 = arith.constant 0 : i32
    %c0_i32_1 = arith.constant 0 : i32
    return %c0_i32, %c0_i32_0 : i32, i32
  }
  func.func @transform_8(%arg0: i32) -> (i32, i32, i32, i32) {
    %c0_i32 = arith.constant 0 : i32
    %c0_i32_0 = arith.constant 0 : i32
    %c0_i32_1 = arith.constant 0 : i32
    %c0_i32_2 = arith.constant 0 : i32
    %c0_i32_3 = arith.constant 0 : i32
    return %c0_i32, %c0_i32_0, %c0_i32_1, %c0_i32_2 : i32, i32, i32, i32
  }
  func.func @transform_9(%arg0: i32) -> (i32, i32, i32, i32) {
    %c0_i32 = arith.constant 0 : i32
    %c0_i32_0 = arith.constant 0 : i32
    %c0_i32_1 = arith.constant 0 : i32
    %c0_i32_2 = arith.constant 0 : i32
    %c0_i32_3 = arith.constant 0 : i32
    return %c0_i32, %c0_i32_0, %c0_i32_1, %c0_i32_2 : i32, i32, i32, i32
  }
  func.func @transform_10(%arg0: i32) -> (i32, i32, i32) {
    %c0_i32 = arith.constant 0 : i32
    %c0_i32_0 = arith.constant 0 : i32
    %c0_i32_1 = arith.constant 0 : i32
    %c0_i32_2 = arith.constant 0 : i32
    return %c0_i32, %c0_i32_0, %c0_i32_1 : i32, i32, i32
  }
  func.func @transform_11(%arg0: i32) -> (i32, i32, i32) {
    %c0_i32 = arith.constant 0 : i32
    %c0_i32_0 = arith.constant 0 : i32
    %c0_i32_1 = arith.constant 0 : i32
    %c0_i32_2 = arith.constant 0 : i32
    return %c0_i32, %c0_i32_0, %c0_i32_1 : i32, i32, i32
  }
  func.func @transform_12(%arg0: i32) -> (i32, i32, i32) {
    %c0_i32 = arith.constant 0 : i32
    %c0_i32_0 = arith.constant 0 : i32
    %c0_i32_1 = arith.constant 0 : i32
    %c0_i32_2 = arith.constant 0 : i32
    return %c0_i32, %c0_i32_0, %c0_i32_1 : i32, i32, i32
  }
  func.func @transform_13(%arg0: i32) -> (i32, i32) {
    %c0_i32 = arith.constant 0 : i32
    %c0_i32_0 = arith.constant 0 : i32
    %c0_i32_1 = arith.constant 0 : i32
    return %c0_i32, %c0_i32_0 : i32, i32
  }
  func.func @transform_14(%arg0: i32) -> (i32, i32) {
    %c0_i32 = arith.constant 0 : i32
    %c0_i32_0 = arith.constant 0 : i32
    %c0_i32_1 = arith.constant 0 : i32
    return %c0_i32, %c0_i32_0 : i32, i32
  }
  func.func @transform_15(%arg0: i32) -> (i32, i32, i32) {
    %c0_i32 = arith.constant 0 : i32
    %c0_i32_0 = arith.constant 0 : i32
    %c0_i32_1 = arith.constant 0 : i32
    return %arg0, %c0_i32, %c0_i32_0 : i32, i32, i32
  }
}

</mosaic_0001>

<bundles_post_ra>
// kernel: tpu_custom_call.1
= control target key start
LH: loop header
LB: loop body
LE: loop exit
PB: predicated region body
PF: predicated region fallthrough
CT: control target
= control target key end

     0   :  { %20 = vsyncpa [#allocation3], 0  ;;  %s3866_s0 = inlined_call_operand.vmem [shape: f32[1,32,128], index: 0, kind: input, shape index: {}]   ;;  %s3867_s1 = inlined_call_operand.hbm [shape: bf16[3,2,64,192], index: 1, kind: input, shape index: {}]   ;;  %s3868_s2 = inlined_call_operand.vmem [shape: f32[3,3,16,64], index: 2, kind: input, shape index: {}]   ;;  %s3869_s3 = inlined_call_operand.hbm [shape: bf16[2,16,16], index: 3, kind: input, shape index: {}]   ;;  %s3870_s4 = inlined_call_operand.hbm [shape: bf16[2,16,32], index: 4, kind: input, shape index: {}]   ;;  %s3871_s5 = inlined_call_operand.vmem [shape: bf16[2,128,64], index: 5, kind: input, shape index: {}]   ;;  %s3872_s6 = inlined_call_operand.vmem [shape: bf16[32,16], index: 6, kind: input, shape index: {}]   ;;  %s3873_s7 = inlined_call_operand.vmem [shape: bf16[64,128], index: 7, kind: input, shape index: {}]   ;;  %s3874_s8 = inlined_call_operand.vmem [shape: bf16[1,2,32,96], index: 8, kind: input, shape index: {}]   ;;  %s3875_s9 = inlined_call_operand.hbm [shape: f32[1,3,8,32], index: 9, kind: input, shape index: {}]   ;;  %s3876_s10 = inlined_call_operand.vmem [shape: bf16[2,8,8], index: 10, kind: input, shape index: {}]   ;;  %s3877_s11 = inlined_call_operand.hbm [shape: bf16[2,8,16], index: 11, kind: input, shape index: {}]   ;;  %s3878_s12 = inlined_call_operand.vmem [shape: bf16[2,64,32], index: 12, kind: input, shape index: {}]   ;;  %s3879_s13 = inlined_call_operand.vmem [shape: bf16[16,8], index: 13, kind: input, shape index: {}]   ;;  %s3880_s14 = inlined_call_operand.hbm [shape: bf16[32,64], index: 14, kind: input, shape index: {}]   ;;  %s3881_s15 = inlined_call_operand.hbm [shape: f32[1,32,128], index: 15, kind: output, shape index: {}]  }
   0x1   :  { %21 = vsyncpa [#allocation6], 0 }
   0x2   :  { %22 = vsyncpa [#allocation9], 0 }
   0x3   :  { %23 = vsyncpa [#allocation12], 0 }
   0x4   :  { %24 = vsyncpa [#allocation4], 0  ;;  %s3342_s18 = smov [#allocation5]  }
   0x5   :  { %s46_s19 = sshll.u32 %s3342_s18, 4  ;;  %s47_s19 = int_to_ptr.vmem [resolvable:$true] %s46_s19 }
   0x6   :  { %s3200_s20 = scalar_lea.vmem %s47_s19, 256  ;;  %p3205_p1 = scmp.lt.s32.totalorder %s47_s19, %s47_s19 }
   0x7   :  { %p3201_p0 = scmp.ne.s32.totalorder %s47_s19, %s3200_s20  ;;  %p3206_p2 = scmp.lt.s32.totalorder %s3200_s20, %s3200_s20 }
   0x9   :  { %p3207_p3 = por %p3206_p2, %p3205_p1 }
   0xb   :  { %p3208_p4 = pnand %p3207_p3, %p3201_p0 }
   0xd   :  { %3211 = shalt.err (!%p3208_p4)
}
   0xe   :  { %s3343_s21 = smov 64   ;;  %s3344_s22 = smov 4  }
   0xf   :  { %52 = dma.hbm_to_vmem [thread:$0]  %s3869_s3, 256, %s47_s19, [#allocation6], %s3343_s21, %s3343_s21, %s3344_s22  }
  0x10   :  { %s3345_s25 = smov [#allocation8]   ;;  %s3346_s27 = smov [#allocation2]  }
  0x11   :  { %s78_s26 = sshll.u32 %s3345_s25, 4  ;;  %s32_s28 = sshll.u32 %s3346_s27, 4  ;;  %s79_s26 = int_to_ptr.vmem [resolvable:$true] %s78_s26  ;;  %s33_s28 = int_to_ptr.vmem [resolvable:$true] %s32_s28 }
  0x12   :  { %s3220_s29 = scalar_lea.vmem %s79_s26, 384  ;;  %p3225_p6 = scmp.lt.s32.totalorder %s79_s26, %s79_s26 }
  0x13   :  { %p3221_p5 = scmp.ne.s32.totalorder %s79_s26, %s3220_s29  ;;  %p3226_p7 = scmp.lt.s32.totalorder %s3220_s29, %s3220_s29 }
  0x15   :  { %p3227_p8 = por %p3226_p7, %p3225_p6 }
  0x17   :  { %p3228_p9 = pnand %p3227_p8, %p3221_p5 }
  0x19   :  { %3231 = shalt.err (!%p3228_p9)
}
  0x1a   :  { %s3347_s30 = smov 128   ;;  %s3348_s16 = smov 8  }
  0x1b   :  { %84 = dma.hbm_to_vmem [thread:$0]  %s3875_s9, 384, %s79_s26, [#allocation9], %s3347_s30, %s3347_s30, %s3348_s16  }
  0x1c   :  { %s3240_s3 = scalar_lea.vmem %s33_s28, 6144  ;;  %p3245_p11 = scmp.lt.s32.totalorder %s33_s28, %s33_s28 }
  0x1d   :  { %p3241_p10 = scmp.ne.s32.totalorder %s33_s28, %s3240_s3  ;;  %p3246_p12 = scmp.lt.s32.totalorder %s3240_s3, %s3240_s3 }
  0x1f   :  { %p3247_p13 = por %p3246_p12, %p3245_p11 }
  0x21   :  { %p3248_p0 = pnand %p3247_p13, %p3241_p10 }
  0x23   :  { %3251 = shalt.err (!%p3248_p0)
}
  0x24   :  { %38 = dma.hbm_to_vmem [thread:$0]  %s3867_s1, 6144, %s33_s28, [#allocation3], %s3347_s30, %s3347_s30, %s3348_s16  }
  0x25   :  { %s3349_s23 = smov [#allocation7]   ;;  %s3350_s25 = smov [#allocation10]  }
  0x26   :  { %s58_s24 = sshll.u32 %s3349_s23, 4  ;;  %s92_s9 = sshll.u32 %s3350_s25, 4  ;;  %s59_s24 = int_to_ptr.vmem [resolvable:$true] %s58_s24  ;;  %s93_s9 = int_to_ptr.vmem [resolvable:$true] %s92_s9 }
  0x27   :  { %s3260_s26 = scalar_lea.vmem %s59_s24, 256  ;;  %p3265_p2 = scmp.lt.s32.totalorder %s59_s24, %s59_s24 }
  0x28   :  { %p3261_p1 = scmp.ne.s32.totalorder %s59_s24, %s3260_s26  ;;  %p3266_p3 = scmp.lt.s32.totalorder %s3260_s26, %s3260_s26 }
  0x2a   :  { %p3267_p4 = por %p3266_p3, %p3265_p2 }
  0x2c   :  { %p3268_p5 = pnand %p3267_p4, %p3261_p1 }
  0x2e   :  { %3271 = shalt.err (!%p3268_p5)
}
  0x2f   :  { %64 = dma.hbm_to_vmem [thread:$0]  %s3870_s4, 256, %s59_s24, [#allocation6], %s3343_s21, %s3343_s21, %s3344_s22  }
  0x30   :  { %s3280_s1 = scalar_lea.vmem %s93_s9, 128  ;;  %p3285_p7 = scmp.lt.s32.totalorder %s93_s9, %s93_s9 }
  0x31   :  { %p3281_p6 = scmp.ne.s32.totalorder %s93_s9, %s3280_s1  ;;  %p3286_p8 = scmp.lt.s32.totalorder %s3280_s1, %s3280_s1 }
  0x33   :  { %p3287_p9 = por %p3286_p8, %p3285_p7 }
  0x35   :  { %p3288_p10 = pnand %p3287_p9, %p3281_p6 }
  0x37   :  { %3291 = shalt.err (!%p3288_p10)
}
  0x38   :  { %98 = dma.hbm_to_vmem [thread:$0]  %s3877_s11, 128, %s93_s9, [#allocation9], %s3343_s21, %s3343_s21, %s3344_s22  }
  0x39   :  { %s3351_s18 = smov [#allocation11]  }
  0x3a   :  { %s108_s3 = sshll.u32 %s3351_s18, 4  ;;  %s109_s3 = int_to_ptr.vmem [resolvable:$true] %s108_s3 }
  0x3b   :  { %s3300_s19 = scalar_lea.vmem %s109_s3, 256  ;;  %p3305_p12 = scmp.lt.s32.totalorder %s109_s3, %s109_s3 }
  0x3c   :  { %p3301_p11 = scmp.ne.s32.totalorder %s109_s3, %s3300_s19  ;;  %p3306_p13 = scmp.lt.s32.totalorder %s3300_s19, %s3300_s19 }
  0x3e   :  { %p3307_p0 = por %p3306_p13, %p3305_p12 }
  0x40   :  { %p3308_p1 = pnand %p3307_p0, %p3301_p11 }
  0x42   :  { %3311 = shalt.err (!%p3308_p1)
}
  0x43   :  { %114 = dma.hbm_to_vmem [thread:$0]  %s3880_s14, 256, %s109_s3, [#allocation12], %s3343_s21, %s3343_s21, %s3344_s22  }
  0x44   :  { %3332 = dma.done.wait [#allocation3], 6144  }
  0x45   :  { %3333 = vsyncadd [#allocation3], 4294961152 }
  0x46   :  { %3334 = dma.done.wait [#allocation6], 512  }
  0x47   :  { %3335 = vsyncadd [#allocation6], 4294966784 }
  0x48   :  { %3336 = dma.done.wait [#allocation9], 512  }
  0x49   :  { %3337 = vsyncadd [#allocation9], 4294966784 }
  0x4a   :  { %3338 = dma.done.wait [#allocation12], 256  }
  0x4b   :  { %3339 = vsyncadd [#allocation12], 4294967040  ;;  %v3079_v0 = vld [vmem:[%s3871_s5 + $0x38] sm:$0xff]   ;;  %v3081_v2 = vld [vmem:[%s3871_s5 + $0x30] sm:$0xff]   ;;  %v3352_v22 = vmov 0.0   ;;  %vm3353_vm0 = vmmov 0  }
  0x4c   :  { %v3080_v1 = vld [vmem:[%s3871_s5 + $0x78] sm:$0xff]   ;;  %2828 = vmatprep.subr.bf16.mxu0 %v3079_v0  ;;  %v3082_v3 = vld [vmem:[%s3871_s5 + $0x70] sm:$0xff]   ;;  %v3083_v4 = vld [vmem:[%s3871_s5 + $0x28] sm:$0xff]   ;;  %vm400_vm1 = vcmask 261120   ;;  %v3354_v47 = vmov 0   ;;  %vm547_vm2 = vcmask 523264  }
  0x4d   :  { %2848 = vmatprep.subr.bf16.mxu1 %v3080_v1  ;;  %2829 = vmatpush3.bf16.msra.mxu0 %v3079_v0  ;;  %v3084_v5 = vld [vmem:[%s3871_s5 + $0x68] sm:$0xff]   ;;  %v3085_v6 = vld [vmem:[%s3871_s5 + $0x20] sm:$0xff]   ;;  %v3087_v8 = vld [vmem:[%s3871_s5 + $0x18] sm:$0xff]   ;;  %vm608_vm3 = vcmask 130048   ;;  %vm1637_vm8 = vcmask 1043456   ;;  %s3355_s26 = smov 96  }
  0x4e   :  { %2849 = vmatpush3.bf16.msra.mxu1 %v3080_v1  ;;  %2830 = vmatprep.subr.bf16.mxu0 %v3081_v2  ;;  %v3086_v7 = vld [vmem:[%s3871_s5 + $0x60] sm:$0xff]   ;;  %v3088_v9 = vld [vmem:[%s3871_s5 + $0x58] sm:$0xff]   ;;  %v3089_v10 = vld [vmem:[%s3871_s5 + $0x10] sm:$0xff]   ;;  %vm1633_vm9 = vcmask 64512   ;;  %s3356_s18 = smov [#allocation13]  }
  0x4f   :  { %2850 = vmatprep.subr.bf16.mxu1 %v3082_v3  ;;  %v134_v11 = vld [vmem:[%s3866_s0] sm:$0xff]  ;;  %v135_v12 = vld [vmem:[%s3866_s0 + $0x8] sm:$0xff]  ;;  %v3090_v13 = vld [vmem:[%s3871_s5 + $0x50] sm:$0xff]  }
  0x50   :  { %v193_v14 = vpack.c.bf16 %v135_v12, %v134_v11  ;;  %v3091_v15 = vld [vmem:[%s3871_s5 + $0x8] sm:$0xff]   ;;  %v3093_v17 = vld [vmem:[%s3871_s5] sm:$0xff]   ;;  %v136_v19 = vld [vmem:[%s3866_s0 + $0x10] sm:$0xff] }
  0x51   :  { %2831 = vmatpush3.bf16.msra.mxu0 %v3081_v2  ;;  %v3092_v16 = vld [vmem:[%s3871_s5 + $0x48] sm:$0xff]   ;;  %v3094_v18 = vld [vmem:[%s3871_s5 + $0x40] sm:$0xff]   ;;  %v137_v20 = vld [vmem:[%s3866_s0 + $0x18] sm:$0xff] }
  0x52   :  { %2851 = vmatpush3.bf16.msra.mxu1 %v3082_v3  ;;  %2832 = vmatprep.subr.bf16.mxu0 %v3083_v4  ;;  %v194_v21 = vpack.c.bf16 %v137_v20, %v136_v19  ;;  %v3099_v36 = vld [vmem:[#allocation2 + $0x34] ss:$8 sps:$4 sm:$0xff]   ;;  %v3097_v40 = vld [vmem:[#allocation2 + $0x30] ss:$8 sps:$4 sm:$0xff]   ;;  %v3102_v41 = vld [vmem:[#allocation2 + $0x24] ss:$8 sps:$4 sm:$0xff]  }
  0x53   :  { %2852 = vmatprep.subr.bf16.mxu1 %v3084_v5  ;;  %2844 = vmatprep.mubr.bf16.mxu0 %v193_v14  ;;  %v3095_v38 = vld [vmem:[#allocation7] sm:$0xff]   ;;  %v3096_v39 = vld [vmem:[#allocation7 + $0x8] sm:$0xff]   ;;  %v3100_v42 = vld [vmem:[#allocation2 + $0x20] ss:$8 sps:$4 sm:$0xff]  }
  0x54   :  { %2864 = vmatprep.mubr.bf16.mxu1 %v193_v14  ;;  %v3105_v43 = vld [vmem:[#allocation2 + $0x14] ss:$8 sps:$4 sm:$0xff]   ;;  %v3103_v44 = vld [vmem:[#allocation2 + $0x10] ss:$8 sps:$4 sm:$0xff]   ;;  %v3108_v45 = vld [vmem:[#allocation2 + $0x4] ss:$8 sps:$4 sm:$0xff]  }
  0x55   :  { %2833 = vmatpush3.bf16.msra.mxu0 %v3083_v4  ;;  %v3106_v46 = vld [vmem:[#allocation2] ss:$8 sps:$4 sm:$0xff]   ;;  %v3113_v3 = vld [vmem:[#allocation2 + $0x74] ss:$8 sps:$4 sm:$0xff]   ;;  %v3111_v4 = vld [vmem:[#allocation2 + $0x70] ss:$8 sps:$4 sm:$0xff]  }
  0x56   :  { %2853 = vmatpush3.bf16.msra.mxu1 %v3084_v5  ;;  %2834 = vmatprep.subr.bf16.mxu0 %v3085_v6  ;;  %v3557_v0 = vld [vmem:[#allocation5] sm:$0xff]   ;;  %v3565_v2 = vld [vmem:[#allocation5 + $0x8] sm:$0xff]  }
  0x57   :  { %2854 = vmatprep.subr.bf16.mxu1 %v3086_v7  ;;  %v3116_v5 = vld [vmem:[#allocation2 + $0x64] ss:$8 sps:$4 sm:$0xff]  }
  0x59   :  { %2835 = vmatpush3.bf16.msra.mxu0 %v3085_v6  ;;  %v3114_v6 = vld [vmem:[#allocation2 + $0x60] ss:$8 sps:$4 sm:$0xff]  }
  0x5a   :  { %2855 = vmatpush3.bf16.msra.mxu1 %v3086_v7  ;;  %2836 = vmatprep.subr.bf16.mxu0 %v3087_v8  ;;  %v3119_v7 = vld [vmem:[#allocation2 + $0x54] ss:$8 sps:$4 sm:$0xff]  }
  0x5b   :  { %2856 = vmatprep.subr.bf16.mxu1 %v3088_v9 }
  0x5d   :  { %2837 = vmatpush3.bf16.msra.mxu0 %v3087_v8  ;;  %v3117_v8 = vld [vmem:[#allocation2 + $0x50] ss:$8 sps:$4 sm:$0xff]  }
  0x5e   :  { %2857 = vmatpush3.bf16.msra.mxu1 %v3088_v9  ;;  %2838 = vmatprep.subr.bf16.mxu0 %v3089_v10  ;;  %v3122_v9 = vld [vmem:[#allocation2 + $0x44] ss:$8 sps:$4 sm:$0xff]  }
  0x5f   :  { %2858 = vmatprep.subr.bf16.mxu1 %v3090_v13 }
  0x61   :  { %2839 = vmatpush3.bf16.msra.mxu0 %v3089_v10  ;;  %v3120_v10 = vld [vmem:[#allocation2 + $0x40] ss:$8 sps:$4 sm:$0xff]  }
  0x62   :  { %2859 = vmatpush3.bf16.msra.mxu1 %v3090_v13  ;;  %2840 = vmatprep.subr.bf16.mxu0 %v3091_v15 }
  0x63   :  { %2860 = vmatprep.subr.bf16.mxu1 %v3092_v16 }
  0x65   :  { %2841 = vmatpush3.bf16.msra.mxu0 %v3091_v15 }
  0x66   :  { %2861 = vmatpush3.bf16.msra.mxu1 %v3092_v16  ;;  %2842 = vmatprep.subr.bf16.mxu0 %v3093_v17 }
  0x67   :  { %2862 = vmatprep.subr.bf16.mxu1 %v3094_v18 }
  0x69   :  { %2843 = vmatpush3.bf16.msra.mxu0 %v3093_v17  ;;  %v504_v17 = vld [vmem:[%s3868_s2] sm:$0xff] }
  0x6a   :  { %2863 = vmatpush3.bf16.msra.mxu1 %v3094_v18  ;;  %2868 = vmatprep.subr.bf16.mxu0 %v3352_v22 }
  0x6b   :  { %2876 = vmatprep.subr.bf16.mxu1 %v3352_v22 }
  0x6c   :  { %2845 = vmatmul.mubr.bf16.vlgmr.msra.gmra.mxu0 %v194_v21 }
  0x6d   :  { %2865 = vmatmul.mubr.bf16.vlgmr.msra.gmra.mxu1 %v194_v21  ;;  %2872 = vmatprep.mubr.msk.bf16.mxu0 %vm3353_vm0, %v3352_v22 }
  0x6e   :  { %2880 = vmatprep.mubr.msk.bf16.mxu1 %vm3353_vm0, %v3352_v22 }
 0x12c   :  { %v2846_v23 = vpop.f32.mrf.mxu0 }
 0x12d   :  { %v2866_v24 = vpop.f32.mrf.mxu1 }
 0x12e   :  { %v277_v25 = vpop.f32.mrf.mxu0  ;;  %v391_v29 = vmax.f32 %v2846_v23, %v2866_v24 }
 0x12f   :  { %v374_v26 = vpop.f32.mrf.mxu1 }
 0x130   :  { %v2847_v27 = vpop.f32.mrf.mxu0  ;;  %v389_v35 = vmax.f32 %v277_v25, %v374_v26  ;;  %v2617_v25 = vld [vmem:[%s3868_s2 + $0x10] sm:$0xff]  ;;  %v505_v26 = vld [vmem:[%s3868_s2 + $0x8] sm:$0xff] }
 0x131   :  { %v2867_v28 = vpop.f32.mrf.mxu1 }
 0x132   :  { %v392_v30 = vmax.f32 %v2847_v27, %v2867_v28  ;;  %v280_v31 = vpop.f32.mrf.mxu0 }
 0x133   :  { %v377_v32 = vpop.f32.mrf.mxu1 }
 0x134   :  { %v394_v33 = vpack.c.bf16 %v392_v30, %v391_v29  ;;  %v390_v34 = vmax.f32 %v280_v31, %v377_v32  ;;  %v2618_v29 = vld [vmem:[%s3868_s2 + $0x18] sm:$0xff] }
 0x136   :  { %2869 = vmatpush3.bf16.msra.mxu0 %v394_v33  ;;  %2877 = vmatpush3.bf16.msra.mxu1 %v394_v33  ;;  %v393_v37 = vpack.c.bf16 %v390_v34, %v389_v35 }
 0x137   :  { %2870 = vmatprep.subr.bf16.mxu0 %v3352_v22  ;;  %2878 = vmatprep.subr.bf16.mxu1 %v3352_v22 }
 0x13a   :  { %2871 = vmatpush3.bf16.msra.mxu0 %v393_v37  ;;  %2879 = vmatpush3.bf16.msra.mxu1 %v393_v37 }
 0x13b   :  { %559 = vmatprep.subr.bf16.mxu0 %v3099_v36  ;;  %2884 = vmatprep.subr.bf16.mxu1 %v3352_v22 }
 0x13d   :  { %2873 = vmatmul.mubr.msk.bf16.vlgmr.msra.gmra.mxu0 %vm400_vm1, %v3095_v38  ;;  %2881 = vmatmul.mubr.msk.bf16.vlgmr.msra.gmra.mxu1 %vm400_vm1, %v3096_v39 }
 0x13e   :  { %560 = vmatpush1.bf16.msra.mxu0 %v3097_v40  ;;  %2886 = vmatprep.mubr.msk.bf16.mxu1 %vm3353_vm0, %v3352_v22 }
 0x13f   :  { %561 = vmatprep.subr.bf16.mxu0 %v3102_v41  ;;  %583 = vmatprep.mubr.bf16.mxu0 %v3354_v47 }
 0x142   :  { %562 = vmatpush1.bf16.msra.mxu0 %v3100_v42 }
 0x143   :  { %563 = vmatprep.subr.bf16.mxu0 %v3105_v43  ;;  %v3125_v43 = vld [vmem:[#allocation2 + $0xb4] ss:$8 sps:$4 sm:$0xff]  }
 0x146   :  { %564 = vmatpush1.bf16.msra.mxu0 %v3103_v44  ;;  %v3123_v44 = vld [vmem:[#allocation2 + $0xb0] ss:$8 sps:$4 sm:$0xff]  }
 0x147   :  { %565 = vmatprep.subr.bf16.mxu0 %v3108_v45  ;;  %v3128_v45 = vld [vmem:[#allocation2 + $0xa4] ss:$8 sps:$4 sm:$0xff]  }
 0x14a   :  { %566 = vmatpush1.bf16.msra.mxu0 %v3106_v46  ;;  %v3126_v46 = vld [vmem:[#allocation2 + $0xa0] ss:$8 sps:$4 sm:$0xff]  }
 0x14b   :  { %780 = vmatprep.subr.bf16.mxu0 %v3113_v3 }
 0x1fd   :  { %v438_v48 = vpop.f32.mrf.mxu0  ;;  %v487_v49 = vpop.f32.mrf.mxu1 }
 0x1fe   :  { %v3547_v54 = vmax.f32 %v438_v48, %v487_v49  ;;  %v3131_v48 = vld [vmem:[#allocation2 + $0x94] ss:$8 sps:$4 sm:$0xff]   ;;  %v3129_v49 = vld [vmem:[#allocation2 + $0x90] ss:$8 sps:$4 sm:$0xff]  }
 0x1ff   :  { %v2874_v50 = vpop.f32.mrf.mxu0  ;;  %v2882_v51 = vpop.f32.mrf.mxu1 }
 0x200   :  { %v3134_v50 = vld [vmem:[#allocation2 + $0x84] ss:$8 sps:$4 sm:$0xff]   ;;  %v3132_v51 = vld [vmem:[#allocation2 + $0x80] ss:$8 sps:$4 sm:$0xff]  }
 0x201   :  { %v441_v52 = vpop.f32.mrf.mxu0  ;;  %v490_v53 = vpop.f32.mrf.mxu1 }
 0x202   :  { %v3549_v55 = vmax.f32 %v441_v52, %v490_v53 }
 0x203   :  { %v2875_v56 = vpop.f32.mrf.mxu0  ;;  %v2883_v57 = vpop.f32.mrf.mxu1 }
 0x204   :  { %v506_v58 = vpack.c.bf16 %v3549_v55, %v3547_v54 }
 0x206   :  { %2612 = vmatmul.mubr.msk.bf16.vlgmr.msra.gmra.mxu0 %vm547_vm2, %v506_v58 }
 0x207   :  { %804 = vmatprep.mubr.bf16.mxu0 %v3354_v47  ;;  %781 = vmatpush1.bf16.msra.mxu0 %v3111_v4  ;;  %v2620_v4 = vld [vmem:[%s3868_s2 + $0x28] sm:$0xff] }
 0x208   :  { %782 = vmatprep.subr.bf16.mxu0 %v3116_v5 }
 0x20b   :  { %783 = vmatpush1.bf16.msra.mxu0 %v3114_v6 }
 0x20c   :  { %784 = vmatprep.subr.bf16.mxu0 %v3119_v7 }
 0x20f   :  { %785 = vmatpush1.bf16.msra.mxu0 %v3117_v8 }
 0x210   :  { %786 = vmatprep.subr.bf16.mxu0 %v3122_v9 }
 0x213   :  { %787 = vmatpush1.bf16.msra.mxu0 %v3120_v10 }
 0x214   :  { %977 = vmatprep.subr.bf16.mxu0 %v3125_v43  ;;  %v2646_v43 = vld [vmem:[%s3868_s2 + $0x48] sm:$0xff] }
 0x2c6   :  { %v585_v59 = vpop.f32.mrf.mxu0 }
 0x2c7   :  { %602 = vrot.lane.b32.xlu0 %v585_v59, %s3343_s21 }
 0x2c8   :  { %v587_v60 = vpop.f32.mrf.mxu0 }
 0x2ca   :  { %v589_v61 = vpop.f32.mrf.mxu0 }
 0x2cb   :  { %v594_v62 = vpack.c.bf16 %v589_v61, %v585_v59  ;;  %604 = vrot.lane.b32.xlu0 %v589_v61, %s3343_s21 }
 0x2cc   :  { %v591_v63 = vpop.f32.mrf.mxu0 }
 0x2cd   :  { %2885 = vmatpush3.bf16.msra.mxu1 %v594_v62  ;;  %v653_v1 = vpack.c.bf16 %v591_v63, %v587_v60  ;;  %v2619_v63 = vld [vmem:[%s3868_s2 + $0x20] sm:$0xff] }
 0x2ce   :  { %2890 = vmatprep.subr.bf16.mxu1 %v3352_v22 }
 0x2d0   :  { %2887 = vmatmul.mubr.msk.bf16.vlgmr.msra.gmra.mxu1 %vm608_vm3, %v3557_v0 }
 0x2d1   :  { %2891 = vmatpush3.bf16.msra.mxu1 %v653_v1  ;;  %2892 = vmatprep.mubr.msk.bf16.mxu1 %vm3353_vm0, %v3352_v22 }
 0x2d2   :  { %2896 = vmatprep.subr.bf16.mxu1 %v3352_v22 }
 0x2d8   :  { %2893 = vmatmul.mubr.msk.bf16.vlgmr.msra.gmra.mxu1 %vm608_vm3, %v3565_v2 }
 0x2d9   :  { %2898 = vmatprep.mubr.msk.bf16.mxu1 %vm3353_vm0, %v3352_v22 }
 0x339   :  { %v603_v13 = vpop.permute.xlu0 %602 }
 0x33d   :  { %v605_v20 = vpop.permute.xlu0 %604 }
 0x390   :  { %v646_v11 = vpop.f32.mrf.mxu1 }
 0x391   :  { %v647_v16 = vadd.f32 %v646_v11, %v603_v13 }
 0x392   :  { %v2888_v12 = vpop.f32.mrf.mxu1 }
 0x394   :  { %v649_v14 = vpop.f32.mrf.mxu1 }
 0x395   :  { %v650_v23 = vadd.f32 %v649_v14, %v605_v20  ;;  %v3138_v20 = vld [vmem:[#allocation2 + $0xe0] ss:$8 sps:$4 sm:$0xff]  }
 0x396   :  { %v2889_v15 = vpop.f32.mrf.mxu1 }
 0x398   :  { %v696_v18 = vpop.f32.mrf.mxu1 }
 0x399   :  { %v703_v19 = vadd.f32 %v696_v18, %v647_v16  ;;  %v3135_v18 = vld [vmem:[#allocation2 + $0xf0] ss:$8 sps:$4 sm:$0xff]  }
 0x39a   :  { %v2894_v21 = vpop.f32.mrf.mxu1 }
 0x39b   :  { %v705_v24 = vadd.f32 %v703_v19, %v504_v17  ;;  %v3137_v17 = vld [vmem:[#allocation2 + $0xf4] ss:$8 sps:$4 sm:$0xff]   ;;  %v3140_v19 = vld [vmem:[#allocation2 + $0xe4] ss:$8 sps:$4 sm:$0xff]  }
 0x39c   :  { %v699_v27 = vpop.f32.mrf.mxu1  ;;  %v3143_v21 = vld [vmem:[#allocation2 + $0xd4] ss:$8 sps:$4 sm:$0xff]  }
 0x39d   :  { %v704_v28 = vadd.f32 %v699_v27, %v650_v23  ;;  %v712_v31 = vmul.f32 %v2617_v25, %v705_v24  ;;  %vm707_vm4 = vcmp.ge.f32.partialorder %v705_v24, 0.0  ;;  %v3141_v23 = vld [vmem:[#allocation2 + $0xd0] ss:$8 sps:$4 sm:$0xff]   ;;  %v3144_v25 = vld [vmem:[#allocation2 + $0xc0] ss:$8 sps:$4 sm:$0xff]  }
 0x39e   :  { %v2895_v30 = vpop.f32.mrf.mxu1 }
 0x39f   :  { %v706_v32 = vadd.f32 %v704_v28, %v505_v26  ;;  %v714_v34 = vsel %vm707_vm4, %v705_v24, %v712_v31  ;;  %v3146_v24 = vld [vmem:[#allocation2 + $0xc4] ss:$8 sps:$4 sm:$0xff]  }
 0x3a1   :  { %vm708_vm5 = vcmp.ge.f32.partialorder %v706_v32, 0.0  ;;  %v713_v33 = vmul.f32 %v2618_v29, %v706_v32 }
 0x3a3   :  { %v715_v35 = vsel %vm708_vm5, %v706_v32, %v713_v33  ;;  %v2632_v32 = vld [vmem:[%s3868_s2 + $0x30] sm:$0xff] }
 0x3a4   :  { %v728_v36 = vpack.c.bf16 %v715_v35, %v714_v34 }
 0x3a6   :  { %2629 = vmatmul.mubr.msk.bf16.vlgmr.msra.gmra.mxu0 %vm547_vm2, %v728_v36 }
 0x3a7   :  { %1001 = vmatprep.mubr.bf16.mxu0 %v3354_v47  ;;  %978 = vmatpush1.bf16.msra.mxu0 %v3123_v44 }
 0x3a8   :  { %979 = vmatprep.subr.bf16.mxu0 %v3128_v45 }
 0x3ab   :  { %980 = vmatpush1.bf16.msra.mxu0 %v3126_v46 }
 0x3ac   :  { %981 = vmatprep.subr.bf16.mxu0 %v3131_v48 }
 0x3af   :  { %982 = vmatpush1.bf16.msra.mxu0 %v3129_v49 }
 0x3b0   :  { %983 = vmatprep.subr.bf16.mxu0 %v3134_v50 }
 0x3b3   :  { %984 = vmatpush1.bf16.msra.mxu0 %v3132_v51 }
 0x3b4   :  { %1181 = vmatprep.subr.bf16.mxu0 %v3137_v17 }
 0x466   :  { %v806_v37 = vpop.f32.mrf.mxu0 }
 0x467   :  { %818 = vrot.lane.b32.xlu1 %v806_v37, %s3343_s21 }
 0x468   :  { %v808_v38 = vpop.f32.mrf.mxu0 }
 0x46a   :  { %v810_v39 = vpop.f32.mrf.mxu0 }
 0x46b   :  { %v815_v40 = vpack.c.bf16 %v810_v39, %v806_v37  ;;  %820 = vrot.lane.b32.xlu1 %v810_v39, %s3343_s21  ;;  %v2645_v39 = vld [vmem:[%s3868_s2 + $0x40] sm:$0xff] }
 0x46c   :  { %v812_v41 = vpop.f32.mrf.mxu0 }
 0x46d   :  { %2897 = vmatpush3.bf16.msra.mxu1 %v815_v40  ;;  %v865_v42 = vpack.c.bf16 %v812_v41, %v808_v38  ;;  %v2633_v40 = vld [vmem:[%s3868_s2 + $0x38] sm:$0xff] }
 0x46e   :  { %2902 = vmatprep.subr.bf16.mxu1 %v3352_v22 }
 0x470   :  { %2899 = vmatmul.mubr.msk.bf16.vlgmr.msra.gmra.mxu1 %vm608_vm3, %v3557_v0 }
 0x471   :  { %2903 = vmatpush3.bf16.msra.mxu1 %v865_v42  ;;  %2904 = vmatprep.mubr.msk.bf16.mxu1 %vm3353_vm0, %v3352_v22 }
 0x472   :  { %2908 = vmatprep.subr.bf16.mxu1 %v3352_v22 }
 0x478   :  { %2905 = vmatmul.mubr.msk.bf16.vlgmr.msra.gmra.mxu1 %vm608_vm3, %v3565_v2 }
 0x479   :  { %2910 = vmatprep.mubr.msk.bf16.mxu1 %vm3353_vm0, %v3352_v22 }
 0x4d9   :  { %v819_v56 = vpop.permute.xlu1 %818 }
 0x4dd   :  { %v821_v62 = vpop.permute.xlu1 %820 }
 0x530   :  { %v858_v52 = vpop.f32.mrf.mxu1 }
 0x531   :  { %v859_v59 = vadd.f32 %v858_v52, %v819_v56 }
 0x532   :  { %v2900_v53 = vpop.f32.mrf.mxu1 }
 0x534   :  { %v861_v57 = vpop.f32.mrf.mxu1 }
 0x535   :  { %v862_v3 = vadd.f32 %v861_v57, %v821_v62  ;;  %v3149_v62 = vld [vmem:[%s3878_s12 + $0x10] sm:$0xff]  }
 0x536   :  { %v2901_v58 = vpop.f32.mrf.mxu1 }
 0x538   :  { %v900_v60 = vpop.f32.mrf.mxu1 }
 0x539   :  { %v907_v61 = vadd.f32 %v900_v60, %v859_v59  ;;  %v3147_v60 = vld [vmem:[%s3878_s12 + $0x18] sm:$0xff]  }
 0x53a   :  { %v2906_v1 = vpop.f32.mrf.mxu1 }
 0x53b   :  { %v909_v6 = vadd.f32 %v2619_v63, %v907_v61  ;;  %v3148_v61 = vld [vmem:[%s3878_s12 + $0x38] sm:$0xff]   ;;  %v3150_v63 = vld [vmem:[%s3878_s12 + $0x30] sm:$0xff]   ;;  %v3151_v1 = vld [vmem:[%s3878_s12 + $0x8] sm:$0xff]  }
 0x53c   :  { %v903_v5 = vpop.f32.mrf.mxu1 }
 0x53d   :  { %v908_v7 = vadd.f32 %v903_v5, %v862_v3  ;;  %v3604_v10 = vadd.f32 %v909_v6, %v3547_v54  ;;  %v3152_v3 = vld [vmem:[%s3878_s12 + $0x28] sm:$0xff]   ;;  %v3154_v5 = vld [vmem:[%s3878_s12 + $0x20] sm:$0xff]  }
 0x53e   :  { %v2907_v8 = vpop.f32.mrf.mxu1 }
 0x53f   :  { %v910_v9 = vadd.f32 %v2620_v4, %v908_v7  ;;  %v3153_v4 = vld [vmem:[%s3878_s12] sm:$0xff]  }
 0x541   :  { %v3607_v11 = vadd.f32 %v910_v9, %v3549_v55 }
 0x543   :  { %v925_v12 = vpack.c.bf16 %v3607_v11, %v3604_v10 }
 0x545   :  { %2642 = vmatmul.mubr.msk.bf16.vlgmr.msra.gmra.mxu0 %vm547_vm2, %v925_v12 }
 0x546   :  { %1205 = vmatprep.mubr.bf16.mxu0 %v3354_v47  ;;  %1182 = vmatpush1.bf16.msra.mxu0 %v3135_v18  ;;  %v2648_v18 = vld [vmem:[%s3868_s2 + $0x58] sm:$0xff] }
 0x547   :  { %1183 = vmatprep.subr.bf16.mxu0 %v3140_v19 }
 0x54a   :  { %1184 = vmatpush1.bf16.msra.mxu0 %v3138_v20 }
 0x54b   :  { %1185 = vmatprep.subr.bf16.mxu0 %v3143_v21 }
 0x54e   :  { %1186 = vmatpush1.bf16.msra.mxu0 %v3141_v23 }
 0x54f   :  { %1187 = vmatprep.subr.bf16.mxu0 %v3146_v24 }
 0x552   :  { %1188 = vmatpush1.bf16.msra.mxu0 %v3144_v25 }
 0x553   :  { %2932 = vmatprep.subr.bf16.mxu0 %v3352_v22 }
 0x605   :  { %v1003_v13 = vpop.f32.mrf.mxu0 }
 0x606   :  { %1015 = vrot.lane.b32.xlu0 %v1003_v13, %s3343_s21 }
 0x607   :  { %v1005_v14 = vpop.f32.mrf.mxu0 }
 0x609   :  { %v1007_v15 = vpop.f32.mrf.mxu0 }
 0x60a   :  { %v1012_v16 = vpack.c.bf16 %v1007_v15, %v1003_v13  ;;  %1017 = vrot.lane.b32.xlu1 %v1007_v15, %s3343_s21 }
 0x60b   :  { %v1009_v54 = vpop.f32.mrf.mxu0 }
 0x60c   :  { %2909 = vmatpush3.bf16.msra.mxu1 %v1012_v16  ;;  %v1062_v55 = vpack.c.bf16 %v1009_v54, %v1005_v14  ;;  %v2647_v54 = vld [vmem:[%s3868_s2 + $0x50] sm:$0xff] }
 0x60d   :  { %2914 = vmatprep.subr.bf16.mxu1 %v3352_v22 }
 0x60f   :  { %2911 = vmatmul.mubr.msk.bf16.vlgmr.msra.gmra.mxu1 %vm608_vm3, %v3557_v0 }
 0x610   :  { %2915 = vmatpush3.bf16.msra.mxu1 %v1062_v55  ;;  %2916 = vmatprep.mubr.msk.bf16.mxu1 %vm3353_vm0, %v3352_v22 }
 0x611   :  { %2920 = vmatprep.subr.bf16.mxu1 %v3352_v22 }
 0x617   :  { %2917 = vmatmul.mubr.msk.bf16.vlgmr.msra.gmra.mxu1 %vm608_vm3, %v3565_v2 }
 0x618   :  { %2922 = vmatprep.mubr.msk.bf16.mxu1 %vm3353_vm0, %v3352_v22 }
 0x678   :  { %v1016_v29 = vpop.permute.xlu0 %1015 }
 0x67c   :  { %v1018_v35 = vpop.permute.xlu1 %1017 }
 0x6cf   :  { %v1055_v26 = vpop.f32.mrf.mxu1 }
 0x6d0   :  { %v1056_v31 = vadd.f32 %v1055_v26, %v1016_v29 }
 0x6d1   :  { %v2912_v27 = vpop.f32.mrf.mxu1 }
 0x6d3   :  { %v1058_v28 = vpop.f32.mrf.mxu1 }
 0x6d4   :  { %v1059_v37 = vadd.f32 %v1058_v28, %v1018_v35 }
 0x6d5   :  { %v2913_v30 = vpop.f32.mrf.mxu1 }
 0x6d7   :  { %v1097_v33 = vpop.f32.mrf.mxu1 }
 0x6d8   :  { %v1104_v34 = vadd.f32 %v1097_v33, %v1056_v31 }
 0x6d9   :  { %v2918_v36 = vpop.f32.mrf.mxu1 }
 0x6da   :  { %v1106_v38 = vadd.f32 %v2632_v32, %v1104_v34 }
 0x6db   :  { %v1100_v41 = vpop.f32.mrf.mxu1 }
 0x6dc   :  { %v1105_v42 = vadd.f32 %v1100_v41, %v1059_v37  ;;  %v1113_v45 = vmul.f32 %v2645_v39, %v1106_v38  ;;  %vm1108_vm6 = vcmp.ge.f32.partialorder %v1106_v38, 0.0  ;;  %v1317_v37 = vld [vmem:[#allocation10] sm:$0xf]  ;;  %v3155_v39 = vld [vmem:[%s3874_s8 + $0x8] sm:$0xff]  }
 0x6dd   :  { %v2919_v44 = vpop.f32.mrf.mxu1 }
 0x6de   :  { %v1107_v46 = vadd.f32 %v2633_v40, %v1105_v42  ;;  %v1115_v49 = vsel %vm1108_vm6, %v1106_v38, %v1113_v45  ;;  %v1319_v38 = vld [vmem:[#allocation10 + $0x4] sm:$0xf]  ;;  %v3156_v40 = vld [vmem:[%s3874_s8] sm:$0xff]  }
 0x6e0   :  { %vm1109_vm7 = vcmp.ge.f32.partialorder %v1107_v46, 0.0  ;;  %v1114_v48 = vmul.f32 %v2646_v43, %v1107_v46 }
 0x6e2   :  { %v1116_v50 = vsel %vm1109_vm7, %v1107_v46, %v1114_v48 }
 0x6e3   :  { %v1129_v51 = vpack.c.bf16 %v1116_v50, %v1115_v49 }
 0x6e5   :  { %2657 = vmatmul.mubr.msk.bf16.vlgmr.msra.gmra.mxu0 %vm547_vm2, %v1129_v51 }
 0x6e6   :  { %2940 = vmatprep.mubr.msk.bf16.mxu0 %vm3353_vm0, %v3352_v22  ;;  %2933 = vmatpush3.bf16.msra.mxu0 %v3147_v60 }
 0x6e7   :  { %2934 = vmatprep.subr.bf16.mxu0 %v3352_v22 }
 0x6ea   :  { %2935 = vmatpush3.bf16.msra.mxu0 %v3149_v62 }
 0x6eb   :  { %2936 = vmatprep.subr.bf16.mxu0 %v3352_v22 }
 0x6ee   :  { %2937 = vmatpush3.bf16.msra.mxu0 %v3151_v1  ;;  %v3157_v1 = vld [vmem:[%s3874_s8 + $0x18] sm:$0xff]  }
 0x6ef   :  { %2938 = vmatprep.subr.bf16.mxu0 %v3352_v22 }
 0x6f2   :  { %2939 = vmatpush3.bf16.msra.mxu0 %v3153_v4 }
 0x6f3   :  { %2956 = vmatprep.subr.bf16.mxu0 %v3352_v22 }
 0x7a5   :  { %v1207_v52 = vpop.f32.mrf.mxu0 }
 0x7a6   :  { %1219 = vrot.lane.b32.xlu0 %v1207_v52, %s3343_s21 }
 0x7a7   :  { %v1209_v53 = vpop.f32.mrf.mxu0 }
 0x7a9   :  { %v1211_v56 = vpop.f32.mrf.mxu0 }
 0x7aa   :  { %v1216_v57 = vpack.c.bf16 %v1211_v56, %v1207_v52  ;;  %1221 = vrot.lane.b32.xlu1 %v1211_v56, %s3343_s21 }
 0x7ab   :  { %v1213_v58 = vpop.f32.mrf.mxu0 }
 0x7ac   :  { %2921 = vmatpush3.bf16.msra.mxu1 %v1216_v57  ;;  %v1266_v59 = vpack.c.bf16 %v1213_v58, %v1209_v53 }
 0x7ad   :  { %2926 = vmatprep.subr.bf16.mxu1 %v3352_v22 }
 0x7af   :  { %2923 = vmatmul.mubr.msk.bf16.vlgmr.msra.gmra.mxu1 %vm608_vm3, %v3557_v0 }
 0x7b0   :  { %2927 = vmatpush3.bf16.msra.mxu1 %v1266_v59  ;;  %2928 = vmatprep.mubr.msk.bf16.mxu1 %vm3353_vm0, %v3352_v22  ;;  %v1314_v59 = vld [vmem:[%s3876_s10] sm:$0xf] }
 0x7b1   :  { %2944 = vmatprep.subr.bf16.mxu1 %v3352_v22 }
 0x7b7   :  { %2929 = vmatmul.mubr.msk.bf16.vlgmr.msra.gmra.mxu1 %vm608_vm3, %v3565_v2 }
 0x7b8   :  { %2952 = vmatprep.mubr.msk.bf16.mxu1 %vm3353_vm0, %v3352_v22  ;;  %2945 = vmatpush3.bf16.msra.mxu1 %v3148_v61 }
 0x7b9   :  { %2946 = vmatprep.subr.bf16.mxu1 %v3352_v22 }
 0x7bc   :  { %2947 = vmatpush3.bf16.msra.mxu1 %v3150_v63  ;;  %v2660_v63 = vld [vmem:[%s3876_s10 + $0x4] sm:$0xf] }
 0x7bd   :  { %2948 = vmatprep.subr.bf16.mxu1 %v3352_v22 }
 0x7c0   :  { %2949 = vmatpush3.bf16.msra.mxu1 %v3152_v3  ;;  %v3158_v3 = vld [vmem:[%s3874_s8 + $0x10] sm:$0xff]   ;;  %s2553_s8 = sshll.u32 %s3356_s18, 4  ;;  %s2554_s8 = int_to_ptr.vmem [resolvable:$true] %s2553_s8 }
 0x7c1   :  { %2950 = vmatprep.subr.bf16.mxu1 %v3352_v22  ;;  %s3312_s10 = scalar_lea.vmem %s2554_s8, 512  ;;  %p3317_p3 = scmp.lt.s32.totalorder %s2554_s8, %s2554_s8 }
 0x7c2   :  { %p3313_p2 = scmp.ne.s32.totalorder %s2554_s8, %s3312_s10  ;;  %p3318_p4 = scmp.lt.s32.totalorder %s3312_s10, %s3312_s10 }
 0x7c4   :  { %2951 = vmatpush3.bf16.msra.mxu1 %v3154_v5  ;;  %p3319_p5 = por %p3318_p4, %p3317_p3 }
 0x7c5   :  { %2962 = vmatprep.subr.bf16.mxu1 %v3352_v22 }
 0x7c6   :  { %p3320_p6 = pnand %p3319_p5, %p3313_p2 }
 0x818   :  { %v1220_v9 = vpop.permute.xlu0 %1219 }
 0x81c   :  { %v1222_v16 = vpop.permute.xlu1 %1221 }
 0x86f   :  { %v1259_v6 = vpop.f32.mrf.mxu1 }
 0x870   :  { %v1260_v13 = vadd.f32 %v1259_v6, %v1220_v9 }
 0x871   :  { %v2924_v7 = vpop.f32.mrf.mxu1 }
 0x873   :  { %v1262_v8 = vpop.f32.mrf.mxu1 }
 0x874   :  { %v1263_v17 = vadd.f32 %v1262_v8, %v1222_v16 }
 0x875   :  { %v2925_v12 = vpop.f32.mrf.mxu1 }
 0x876   :  { %v1571_v12 = vld [vmem:[#allocation8] sm:$0xff] }
 0x877   :  { %v1301_v14 = vpop.f32.mrf.mxu1 }
 0x878   :  { %v1308_v15 = vadd.f32 %v1301_v14, %v1260_v13 }
 0x879   :  { %v2930_v55 = vpop.f32.mrf.mxu1 }
 0x87a   :  { %v1310_v20 = vadd.f32 %v2647_v54, %v1308_v15  ;;  %v1734_v15 = vld [vmem:[#allocation8 + $0x8] sm:$0xff] }
 0x87b   :  { %v1304_v19 = vpop.f32.mrf.mxu1 }
 0x87c   :  { %v1309_v21 = vadd.f32 %v1304_v19, %v1263_v17  ;;  %v3692_v25 = vadd.f32 %v1310_v20, %v3604_v10 }
 0x87d   :  { %v2931_v23 = vpop.f32.mrf.mxu1 }
 0x87e   :  { %v1311_v24 = vadd.f32 %v2648_v18, %v1309_v21 }
 0x880   :  { %v3695_v26 = vadd.f32 %v1311_v24, %v3607_v11 }
 0x882   :  { %v1343_v27 = vpack.c.bf16 %v3695_v26, %v3692_v25 }
 0x884   :  { %2941 = vmatmul.mubr.msk.bf16.vlgmr.msra.gmra.mxu0 %vm547_vm2, %v1343_v27  ;;  %2953 = vmatmul.mubr.msk.bf16.vlgmr.msra.gmra.mxu1 %vm547_vm2, %v1343_v27 }
 0x885   :  { %2958 = vmatprep.mubr.msk.bf16.mxu0 %vm3353_vm0, %v3352_v22  ;;  %2964 = vmatprep.mubr.msk.bf16.mxu1 %vm3353_vm0, %v3352_v22 }
 0x944   :  { %v1405_v28 = vpop.f32.mrf.mxu0  ;;  %v1470_v29 = vpop.f32.mrf.mxu1 }
 0x945   :  { %v1477_v32 = vmax.f32 %v1405_v28, %v1470_v29 }
 0x946   :  { %v2942_v10 = vpop.f32.mrf.mxu0  ;;  %v2954_v30 = vpop.f32.mrf.mxu1 }
 0x948   :  { %v1408_v31 = vpop.f32.mrf.mxu0  ;;  %v1473_v11 = vpop.f32.mrf.mxu1 }
 0x949   :  { %v1478_v33 = vmax.f32 %v1408_v31, %v1473_v11  ;;  %v3159_v31 = vld [vmem:[#allocation11 + $0x8] sm:$0xff]   ;;  %v3160_v11 = vld [vmem:[#allocation11] sm:$0xff]  }
 0x94a   :  { %v2943_v34 = vpop.f32.mrf.mxu0  ;;  %v2955_v35 = vpop.f32.mrf.mxu1 }
 0x94b   :  { %v1479_v36 = vpack.c.bf16 %v1478_v33, %v1477_v32 }
 0x94d   :  { %2957 = vmatpush3.bf16.msra.mxu0 %v1479_v36  ;;  %2963 = vmatpush3.bf16.msra.mxu1 %v1479_v36 }
 0x94e   :  { %2968 = vmatprep.subr.bf16.mxu0 %v3352_v22  ;;  %2976 = vmatprep.subr.bf16.mxu1 %v3352_v22 }
 0x950   :  { %2959 = vmatmul.mubr.msk.bf16.vlgmr.msra.gmra.mxu0 %vm608_vm3, %v1317_v37  ;;  %2965 = vmatmul.mubr.msk.bf16.vlgmr.msra.gmra.mxu1 %vm608_vm3, %v1319_v38  ;;  %v1743_v38 = vld [vmem:[#allocation8 + $0x10] sm:$0xff] }
 0x951   :  { %2969 = vmatpush3.bf16.msra.mxu0 %v3155_v39  ;;  %2972 = vmatprep.mubr.msk.bf16.mxu0 %vm3353_vm0, %v3352_v22 }
 0x952   :  { %2970 = vmatprep.subr.bf16.mxu0 %v3352_v22  ;;  %2978 = vmatprep.mubr.msk.bf16.mxu1 %vm3353_vm0, %v3352_v22 }
 0x955   :  { %2971 = vmatpush3.bf16.msra.mxu0 %v3156_v40 }
 0x956   :  { %2982 = vmatprep.subr.bf16.mxu0 %v3352_v22 }
 0xa10   :  { %v1517_v41 = vpop.f32.mrf.mxu0  ;;  %v1560_v42 = vpop.f32.mrf.mxu1 }
 0xa11   :  { %v3721_v43 = vmax.f32 %v1517_v41, %v1560_v42 }
 0xa12   :  { %v2960_v44 = vpop.f32.mrf.mxu0  ;;  %v2966_v45 = vpop.f32.mrf.mxu1 }
 0xa13   :  { %v1572_v46 = vpack.c.bf16 %v3721_v43, %v3721_v43 }
 0xa14   :  { %v1520_v48 = vpop.f32.mrf.mxu0  ;;  %v1563_v49 = vpop.f32.mrf.mxu1 }
 0xa15   :  { %2973 = vmatmul.mubr.msk.bf16.vlgmr.msra.gmra.mxu0 %vm400_vm1, %v1572_v46  ;;  %v3162_v49 = vld [vmem:[#allocation2 + $0x130] ss:$8 sps:$4 sm:$0xff]  }
 0xa16   :  { %v2961_v50 = vpop.f32.mrf.mxu0  ;;  %v2967_v51 = vpop.f32.mrf.mxu1  ;;  %2984 = vmatprep.mubr.msk.bf16.mxu0 %vm3353_vm0, %v3352_v22 }
 0xa17   :  { %v3164_v50 = vld [vmem:[#allocation2 + $0x134] ss:$8 sps:$4 sm:$0xff]   ;;  %v3167_v51 = vld [vmem:[#allocation2 + $0x124] ss:$8 sps:$4 sm:$0xff]  }
 0xad5   :  { %v1622_v52 = vpop.f32.mrf.mxu0 }
 0xad6   :  { %1630 = vrot.lane.b32.xlu1 %v1622_v52, %s3355_s26  ;;  %v1628_v53 = vpack.c.bf16 %v1622_v52, %v1622_v52  ;;  %v3165_v52 = vld [vmem:[#allocation2 + $0x120] ss:$8 sps:$4 sm:$0xff]  }
 0xad7   :  { %v2974_v56 = vpop.f32.mrf.mxu0 }
 0xad8   :  { %1682 = vrot.lane.b32.xlu0 %v1628_v53, %s3343_s21  ;;  %v1639_v57 = vsel %vm1637_vm8, %v1628_v53, 0 }
 0xad9   :  { %v1625_v58 = vpop.f32.mrf.mxu0  ;;  %2977 = vmatpush3.bf16.msra.mxu1 %v1639_v57 }
 0xada   :  { %2988 = vmatprep.subr.bf16.mxu1 %v3352_v22 }
 0xadb   :  { %v2975_v60 = vpop.f32.mrf.mxu0 }
 0xadc   :  { %2979 = vmatmul.mubr.msk.bf16.vlgmr.msra.gmra.mxu1 %vm1633_vm9, %v1314_v59 }
 0xadd   :  { %2992 = vmatprep.mubr.msk.bf16.mxu1 %vm3353_vm0, %v3352_v22  ;;  %2989 = vmatpush3.bf16.msra.mxu1 %v3157_v1  ;;  %v3171_v1 = vld [vmem:[#allocation2 + $0x100] ss:$8 sps:$4 sm:$0xff]  }
 0xade   :  { %2990 = vmatprep.subr.bf16.mxu1 %v3352_v22 }
 0xae1   :  { %2991 = vmatpush3.bf16.msra.mxu1 %v3158_v3 }
 0xae2   :  { %3002 = vmatprep.subr.bf16.mxu1 %v3352_v22 }
 0xb48   :  { %v1631_v8 = vpop.permute.xlu1 %1630 }
 0xb4a   :  { %v1683_v61 = vpop.permute.xlu0 %1682 }
 0xb4b   :  { %v1688_v62 = vsel %vm1637_vm8, %v1683_v61, 0  ;;  %v3170_v61 = vld [vmem:[#allocation2 + $0x114] ss:$8 sps:$4 sm:$0xff]  }
 0xb4c   :  { %2983 = vmatpush3.bf16.msra.mxu0 %v1688_v62  ;;  %v3168_v62 = vld [vmem:[#allocation2 + $0x110] ss:$8 sps:$4 sm:$0xff]  }
 0xb4d   :  { %2996 = vmatprep.subr.bf16.mxu0 %v3352_v22 }
 0xb4f   :  { %2985 = vmatmul.mubr.msk.bf16.vlgmr.msra.gmra.mxu0 %vm1633_vm9, %v2660_v63 }
 0xb50   :  { %2998 = vmatprep.mubr.msk.bf16.mxu0 %vm3353_vm0, %v3352_v22 }
 0xb9c   :  { %v1675_v4 = vpop.f32.mrf.mxu1 }
 0xb9d   :  { %v1676_v9 = vadd.f32 %v1675_v4, %v1631_v8 }
 0xb9e   :  { %v2980_v5 = vpop.f32.mrf.mxu1 }
 0xba0   :  { %v1678_v6 = vpop.f32.mrf.mxu1 }
 0xba2   :  { %v2981_v7 = vpop.f32.mrf.mxu1 }
 0xc0f   :  { %v1724_v13 = vpop.f32.mrf.mxu0 }
 0xc10   :  { %v1730_v14 = vadd.f32 %v1724_v13, %v1676_v9 }
 0xc11   :  { %v2986_v16 = vpop.f32.mrf.mxu0 }
 0xc12   :  { %v1731_v54 = vadd.f32 %v1730_v14, %v1571_v12  ;;  %v3174_v16 = vld [vmem:[#allocation2 + $0x170] ss:$8 sps:$4 sm:$0xff]  }
 0xc13   :  { %v1727_v55 = vpop.f32.mrf.mxu0 }
 0xc14   :  { %vm1732_vm10 = vcmp.ge.f32.partialorder %v1731_v54, 0.0  ;;  %v1735_v17 = vmul.f32 %v1734_v15, %v1731_v54  ;;  %v3177_v55 = vld [vmem:[#allocation2 + $0x160] ss:$8 sps:$4 sm:$0xff]  }
 0xc15   :  { %v2987_v18 = vpop.f32.mrf.mxu0 }
 0xc16   :  { %v1736_v19 = vsel %vm1732_vm10, %v1731_v54, %v1735_v17  ;;  %v3179_v54 = vld [vmem:[#allocation2 + $0x164] ss:$8 sps:$4 sm:$0xff]   ;;  %v3182_v17 = vld [vmem:[#allocation2 + $0x154] ss:$8 sps:$4 sm:$0xff]   ;;  %v3180_v18 = vld [vmem:[#allocation2 + $0x150] ss:$8 sps:$4 sm:$0xff]  }
 0xc17   :  { %v1744_v20 = vpack.c.bf16 %v1736_v19, %v1736_v19  ;;  %v3185_v19 = vld [vmem:[#allocation2 + $0x144] ss:$8 sps:$4 sm:$0xff]  }
 0xc19   :  { %2993 = vmatmul.mubr.msk.bf16.vlgmr.msra.gmra.mxu1 %vm400_vm1, %v1744_v20  ;;  %v3183_v20 = vld [vmem:[#allocation2 + $0x140] ss:$8 sps:$4 sm:$0xff]  }
 0xc1a   :  { %3004 = vmatprep.mubr.msk.bf16.mxu1 %vm3353_vm0, %v3352_v22 }
 0xcd9   :  { %v1794_v21 = vpop.f32.mrf.mxu1 }
 0xcda   :  { %1802 = vrot.lane.b32.xlu1 %v1794_v21, %s3355_s26  ;;  %v1800_v23 = vpack.c.bf16 %v1794_v21, %v1794_v21 }
 0xcdb   :  { %v2994_v24 = vpop.f32.mrf.mxu1 }
 0xcdc   :  { %1849 = vrot.lane.b32.xlu0 %v1800_v23, %s3343_s21  ;;  %v1806_v27 = vsel %vm1637_vm8, %v1800_v23, 0 }
 0xcdd   :  { %v1797_v28 = vpop.f32.mrf.mxu1  ;;  %2997 = vmatpush3.bf16.msra.mxu0 %v1806_v27 }
 0xcde   :  { %3008 = vmatprep.subr.bf16.mxu0 %v3352_v22 }
 0xcdf   :  { %v2995_v29 = vpop.f32.mrf.mxu1 }
 0xce0   :  { %2999 = vmatmul.mubr.msk.bf16.vlgmr.msra.gmra.mxu0 %vm1633_vm9, %v1314_v59 }
 0xce1   :  { %3012 = vmatprep.mubr.msk.bf16.mxu0 %vm3353_vm0, %v3352_v22  ;;  %3009 = vmatpush3.bf16.msra.mxu0 %v3159_v31 }
 0xce2   :  { %3010 = vmatprep.subr.bf16.mxu0 %v3352_v22 }
 0xce5   :  { %3011 = vmatpush3.bf16.msra.mxu0 %v3160_v11 }
 0xce6   :  { %2072 = vmatprep.subr.bf16.mxu0 %v3164_v50 }
 0xd4c   :  { %v1803_v36 = vpop.permute.xlu1 %1802 }
 0xd4e   :  { %v1850_v10 = vpop.permute.xlu0 %1849 }
 0xd4f   :  { %v1852_v30 = vsel %vm1637_vm8, %v1850_v10, 0  ;;  %v2700_v10 = vld [vmem:[%s3868_s2 + $0x60] sm:$0xff] }
 0xd50   :  { %3003 = vmatpush3.bf16.msra.mxu1 %v1852_v30 }
 0xd51   :  { %3016 = vmatprep.subr.bf16.mxu1 %v3352_v22 }
 0xd53   :  { %3005 = vmatmul.mubr.msk.bf16.vlgmr.msra.gmra.mxu1 %vm1633_vm9, %v2660_v63  ;;  %v3173_v63 = vld [vmem:[#allocation2 + $0x104] ss:$8 sps:$4 sm:$0xff]  }
 0xd54   :  { %3018 = vmatprep.mubr.msk.bf16.mxu1 %vm3353_vm0, %v3352_v22 }
 0xda0   :  { %v1842_v32 = vpop.f32.mrf.mxu0 }
 0xda1   :  { %v1843_v37 = vadd.f32 %v1842_v32, %v1803_v36  ;;  %v2701_v36 = vld [vmem:[%s3868_s2 + $0x68] sm:$0xff] }
 0xda2   :  { %v3000_v33 = vpop.f32.mrf.mxu0 }
 0xda4   :  { %v1845_v34 = vpop.f32.mrf.mxu0 }
 0xda6   :  { %v3001_v35 = vpop.f32.mrf.mxu0 }
 0xda7   :  { %v2713_v35 = vld [vmem:[%s3868_s2 + $0x70] sm:$0xff] }
 0xe13   :  { %v1888_v39 = vpop.f32.mrf.mxu1 }
 0xe14   :  { %v1894_v40 = vadd.f32 %v1888_v39, %v1843_v37  ;;  %v2714_v39 = vld [vmem:[%s3868_s2 + $0x78] sm:$0xff] }
 0xe15   :  { %v3006_v41 = vpop.f32.mrf.mxu1 }
 0xe16   :  { %v1895_v42 = vadd.f32 %v1894_v40, %v1743_v38 }
 0xe17   :  { %v1891_v44 = vpop.f32.mrf.mxu1 }
 0xe18   :  { %v1896_v45 = vadd.f32 %v1895_v42, %v3721_v43  ;;  %v3161_v43 = vld [vmem:[%s3879_s13] sm:$0xff]  }
 0xe19   :  { %v3007_v46 = vpop.f32.mrf.mxu1 }
 0xe1a   :  { %v1897_v48 = vpack.c.bf16 %v1896_v45, %v1896_v45 }
 0xe1c   :  { %3013 = vmatmul.mubr.msk.bf16.vlgmr.msra.gmra.mxu0 %vm400_vm1, %v1897_v48 }
 0xe1d   :  { %2096 = vmatprep.mubr.bf16.mxu0 %v3354_v47  ;;  %2073 = vmatpush1.bf16.msra.mxu0 %v3162_v49 }
 0xe1e   :  { %2074 = vmatprep.subr.bf16.mxu0 %v3167_v51 }
 0xe21   :  { %2075 = vmatpush1.bf16.msra.mxu0 %v3165_v52 }
 0xe22   :  { %2076 = vmatprep.subr.bf16.mxu0 %v3170_v61 }
 0xe25   :  { %2077 = vmatpush1.bf16.msra.mxu0 %v3168_v62 }
 0xe26   :  { %2078 = vmatprep.subr.bf16.mxu0 %v3173_v63 }
 0xe29   :  { %2079 = vmatpush1.bf16.msra.mxu0 %v3171_v1 }
 0xedc   :  { %v1947_v53 = vpop.f32.mrf.mxu0 }
 0xedd   :  { %v1953_v56 = vpack.c.bf16 %v1947_v53, %v1947_v53 }
 0xede   :  { %v3014_v57 = vpop.f32.mrf.mxu0 }
 0xedf   :  { %v1963_v58 = vsel %vm1637_vm8, %v1953_v56, 0  ;;  %v3186_v57 = vld [vmem:[%s3873_s7 + $0x18] sm:$0xff]  }
 0xee0   :  { %v1950_v59 = vpop.f32.mrf.mxu0  ;;  %3017 = vmatpush3.bf16.msra.mxu1 %v1963_v58  ;;  %v3187_v58 = vld [vmem:[%s3873_s7 + $0x10] sm:$0xff]  }
 0xee1   :  { %3022 = vmatprep.subr.bf16.mxu1 %v3352_v22 }
 0xee2   :  { %v3015_v60 = vpop.f32.mrf.mxu0 }
 0xee3   :  { %3019 = vmatmul.mubr.msk.bf16.vlgmr.msra.gmra.mxu1 %vm1633_vm9, %v3161_v43 }
 0xee4   :  { %3024 = vmatprep.mubr.msk.bf16.mxu1 %vm3353_vm0, %v3352_v22 }
 0xfa3   :  { %v1999_v3 = vpop.f32.mrf.mxu1 }
 0xfa4   :  { %v3782_v6 = vadd.f32 %v1999_v3, %v3692_v25 }
 0xfa5   :  { %v3020_v4 = vpop.f32.mrf.mxu1 }
 0xfa7   :  { %v2002_v5 = vpop.f32.mrf.mxu1 }
 0xfa8   :  { %v3785_v7 = vadd.f32 %v2002_v5, %v3695_v26  ;;  %v2715_v5 = vld [vmem:[%s3868_s2 + $0x80] sm:$0xff] }
 0xfa9   :  { %v3021_v8 = vpop.f32.mrf.mxu1 }
 0xfaa   :  { %v2020_v9 = vpack.c.bf16 %v3785_v7, %v3782_v6 }
 0xfac   :  { %2710 = vmatmul.mubr.msk.bf16.vlgmr.msra.gmra.mxu0 %vm547_vm2, %v2020_v9  ;;  %v2716_v9 = vld [vmem:[%s3868_s2 + $0x88] sm:$0xff] }
 0xfad   :  { %2300 = vmatprep.mubr.bf16.mxu0 %v3354_v47  ;;  %v3176_v47 = vld [vmem:[#allocation2 + $0x174] ss:$8 sps:$4 sm:$0xff]  }
 0xfae   :  { %2276 = vmatprep.subr.bf16.mxu0 %v3176_v47 }
 0xfaf   :  { %2277 = vmatpush1.bf16.msra.mxu0 %v3174_v16 }
 0xfb0   :  { %2278 = vmatprep.subr.bf16.mxu0 %v3179_v54  ;;  %v3190_v54 = vld [vmem:[%s3872_s6] sm:$0xff]  }
 0xfb3   :  { %2279 = vmatpush1.bf16.msra.mxu0 %v3177_v55 }
 0xfb4   :  { %2280 = vmatprep.subr.bf16.mxu0 %v3182_v17 }
 0xfb7   :  { %2281 = vmatpush1.bf16.msra.mxu0 %v3180_v18 }
 0xfb8   :  { %2282 = vmatprep.subr.bf16.mxu0 %v3185_v19 }
 0xfbb   :  { %2283 = vmatpush1.bf16.msra.mxu0 %v3183_v20 }
 0xfbc   :  { %3046 = vmatprep.subr.bf16.mxu0 %v3352_v22 }
0x106c   :  { %v2098_v12 = vpop.f32.mrf.mxu0 }
0x106d   :  { %2110 = vrot.lane.b32.xlu0 %v2098_v12, %s3343_s21 }
0x106e   :  { %v2100_v13 = vpop.f32.mrf.mxu0 }
0x1070   :  { %v2102_v14 = vpop.f32.mrf.mxu0 }
0x1071   :  { %v2107_v15 = vpack.c.bf16 %v2102_v14, %v2098_v12  ;;  %2112 = vrot.lane.b32.xlu1 %v2102_v14, %s3343_s21 }
0x1072   :  { %v2104_v25 = vpop.f32.mrf.mxu0 }
0x1073   :  { %3023 = vmatpush3.bf16.msra.mxu1 %v2107_v15  ;;  %v2157_v26 = vpack.c.bf16 %v2104_v25, %v2100_v13 }
0x1074   :  { %3028 = vmatprep.subr.bf16.mxu1 %v3352_v22 }
0x1076   :  { %3025 = vmatmul.mubr.msk.bf16.vlgmr.msra.gmra.mxu1 %vm608_vm3, %v3557_v0 }
0x1077   :  { %3029 = vmatpush3.bf16.msra.mxu1 %v2157_v26  ;;  %3030 = vmatprep.mubr.msk.bf16.mxu1 %vm3353_vm0, %v3352_v22 }
0x1078   :  { %3034 = vmatprep.subr.bf16.mxu1 %v3352_v22 }
0x107e   :  { %3031 = vmatmul.mubr.msk.bf16.vlgmr.msra.gmra.mxu1 %vm608_vm3, %v3565_v2 }
0x107f   :  { %3036 = vmatprep.mubr.msk.bf16.mxu1 %vm3353_vm0, %v3352_v22 }
0x10df   :  { %v2111_v27 = vpop.permute.xlu0 %2110 }
0x10e3   :  { %v2113_v11 = vpop.permute.xlu1 %2112 }
0x1136   :  { %v2150_v21 = vpop.f32.mrf.mxu1 }
0x1137   :  { %v2151_v29 = vadd.f32 %v2150_v21, %v2111_v27 }
0x1138   :  { %v3026_v23 = vpop.f32.mrf.mxu1 }
0x113a   :  { %v2153_v24 = vpop.f32.mrf.mxu1 }
0x113b   :  { %v2154_v33 = vadd.f32 %v2153_v24, %v2113_v11 }
0x113c   :  { %v3027_v28 = vpop.f32.mrf.mxu1 }
0x113e   :  { %v2192_v30 = vpop.f32.mrf.mxu1 }
0x113f   :  { %v2199_v31 = vadd.f32 %v2192_v30, %v2151_v29 }
0x1140   :  { %v3032_v32 = vpop.f32.mrf.mxu1 }
0x1141   :  { %v2201_v34 = vadd.f32 %v2700_v10, %v2199_v31 }
0x1142   :  { %v2195_v37 = vpop.f32.mrf.mxu1 }
0x1143   :  { %v2200_v38 = vadd.f32 %v2195_v37, %v2154_v33  ;;  %v2208_v41 = vmul.f32 %v2713_v35, %v2201_v34  ;;  %vm2203_vm11 = vcmp.ge.f32.partialorder %v2201_v34, 0.0 }
0x1144   :  { %v3033_v40 = vpop.f32.mrf.mxu1 }
0x1145   :  { %v2202_v42 = vadd.f32 %v2701_v36, %v2200_v38  ;;  %v2210_v45 = vsel %vm2203_vm11, %v2201_v34, %v2208_v41 }
0x1147   :  { %vm2204_vm12 = vcmp.ge.f32.partialorder %v2202_v42, 0.0  ;;  %v2209_v44 = vmul.f32 %v2714_v39, %v2202_v42 }
0x1149   :  { %v2211_v46 = vsel %vm2204_vm12, %v2202_v42, %v2209_v44 }
0x114a   :  { %v2224_v48 = vpack.c.bf16 %v2211_v46, %v2210_v45 }
0x114c   :  { %2725 = vmatmul.mubr.msk.bf16.vlgmr.msra.gmra.mxu0 %vm547_vm2, %v2224_v48 }
0x114d   :  { %3054 = vmatprep.mubr.msk.bf16.mxu0 %vm3353_vm0, %v3352_v22  ;;  %3047 = vmatpush3.bf16.msra.mxu0 %v3186_v57 }
0x114e   :  { %3048 = vmatprep.subr.bf16.mxu0 %v3352_v22 }
0x1151   :  { %3049 = vmatpush3.bf16.msra.mxu0 %v3187_v58 }
0x1152   :  { %3050 = vmatprep.subr.bf16.mxu0 %v3352_v22 }
0x120c   :  { %v2302_v49 = vpop.f32.mrf.mxu0 }
0x120d   :  { %2314 = vrot.lane.b32.xlu0 %v2302_v49, %s3343_s21 }
0x120e   :  { %v2304_v50 = vpop.f32.mrf.mxu0 }
0x1210   :  { %v2306_v51 = vpop.f32.mrf.mxu0 }
0x1211   :  { %v2311_v52 = vpack.c.bf16 %v2306_v51, %v2302_v49  ;;  %2316 = vrot.lane.b32.xlu1 %v2306_v51, %s3343_s21 }
0x1212   :  { %v2308_v53 = vpop.f32.mrf.mxu0 }
0x1213   :  { %3035 = vmatpush3.bf16.msra.mxu1 %v2311_v52  ;;  %v2361_v56 = vpack.c.bf16 %v2308_v53, %v2304_v50 }
0x1214   :  { %3040 = vmatprep.subr.bf16.mxu1 %v3352_v22 }
0x1216   :  { %3037 = vmatmul.mubr.msk.bf16.vlgmr.msra.gmra.mxu1 %vm608_vm3, %v3557_v0  ;;  %v3188_v0 = vld [vmem:[%s3873_s7 + $0x8] sm:$0xff]  }
0x1217   :  { %3041 = vmatpush3.bf16.msra.mxu1 %v2361_v56  ;;  %3042 = vmatprep.mubr.msk.bf16.mxu1 %vm3353_vm0, %v3352_v22 }
0x1218   :  { %3051 = vmatpush3.bf16.msra.mxu0 %v3188_v0 }
0x1219   :  { %3052 = vmatprep.subr.bf16.mxu0 %v3352_v22 }
0x121e   :  { %3043 = vmatmul.mubr.msk.bf16.vlgmr.msra.gmra.mxu1 %vm608_vm3, %v3565_v2  ;;  %v3189_v2 = vld [vmem:[%s3873_s7] sm:$0xff]  }
0x121f   :  { %3053 = vmatpush3.bf16.msra.mxu0 %v3189_v2  ;;  %3060 = vmatprep.mubr.msk.bf16.mxu1 %vm608_vm3, %v3190_v54 }
0x127f   :  { %v2315_v61 = vpop.permute.xlu0 %2314 }
0x1283   :  { %v2317_v4 = vpop.permute.xlu1 %2316 }
0x12d6   :  { %v2354_v43 = vpop.f32.mrf.mxu1 }
0x12d7   :  { %v2355_v63 = vadd.f32 %v2354_v43, %v2315_v61 }
0x12d8   :  { %v3038_v59 = vpop.f32.mrf.mxu1 }
0x12da   :  { %v2357_v60 = vpop.f32.mrf.mxu1 }
0x12db   :  { %v2358_v22 = vadd.f32 %v2357_v60, %v2317_v4 }
0x12dc   :  { %v3039_v62 = vpop.f32.mrf.mxu1 }
0x12de   :  { %v2396_v1 = vpop.f32.mrf.mxu1 }
0x12df   :  { %v2403_v3 = vadd.f32 %v2396_v1, %v2355_v63 }
0x12e0   :  { %v3044_v8 = vpop.f32.mrf.mxu1 }
0x12e1   :  { %v2405_v13 = vadd.f32 %v2715_v5, %v2403_v3 }
0x12e2   :  { %v2399_v12 = vpop.f32.mrf.mxu1 }
0x12e3   :  { %v2404_v14 = vadd.f32 %v2399_v12, %v2358_v22  ;;  %v2407_v26 = vadd.f32 %v2405_v13, %v3782_v6  ;;  %v3191_v6 = vld [vmem:[%s3872_s6 + $0x8] sm:$0xff]  }
0x12e4   :  { %v3045_v15 = vpop.f32.mrf.mxu1 }
0x12e5   :  { %v2406_v25 = vadd.f32 %v2716_v9, %v2404_v14 }
0x12e7   :  { %v2408_v47 = vadd.f32 %v2406_v25, %v3785_v7 }
0x12e9   :  { %v2409_v16 = vpack.c.bf16 %v2408_v47, %v2407_v26 }
0x12eb   :  { %3055 = vmatmul.mubr.msk.bf16.vlgmr.msra.gmra.mxu0 %vm547_vm2, %v2409_v16 }
0x13ab   :  { %v2471_v55 = vpop.f32.mrf.mxu0 }
0x13ad   :  { %v3056_v17 = vpop.f32.mrf.mxu0 }
0x13af   :  { %v2474_v18 = vpop.f32.mrf.mxu0 }
0x13b0   :  { %v2478_v19 = vpack.c.bf16 %v2474_v18, %v2471_v55 }
0x13b1   :  { %v3057_v20 = vpop.f32.mrf.mxu0 }
0x13b2   :  { %3058 = vmatprep.subr.bf16.mxu1 %v2478_v19 }
0x13b3   :  { %3059 = vmatpush3.bf16.msra.mxu1 %v2478_v19 }
0x13b6   :  { %3061 = vmatmul.mubr.msk.bf16.vlgmr.msra.gmra.mxu1 %vm608_vm3, %v3191_v6 }
0x1476   :  { %v3062_v7 = vpop.f32.mrf.mxu1 }
0x1477   :  { %2546 = vst [vmem:[#allocation13 + $0x10] sm:$0xff] %v3062_v7 }
0x1478   :  { %v2529_v21 = vpop.f32.mrf.mxu1 }
0x1479   :  { %2544 = vst [vmem:[#allocation13] sm:$0xff] %v2529_v21 }
0x147a   :  { %v3063_v23 = vpop.f32.mrf.mxu1 }
0x147b   :  { %2547 = vst [vmem:[#allocation13 + $0x18] sm:$0xff] %v3063_v23 }
0x147c   :  { %v2532_v24 = vpop.f32.mrf.mxu1 }
0x147d   :  { %2545 = vst [vmem:[#allocation13 + $0x8] sm:$0xff] %v2532_v24 }
0x147e   :  { %3323 = shalt.err (!%p3320_p6)
}
0x147f   :  { %2559 = dma.vmem_to_hbm [thread:$0]  %s2554_s8, 512, %s3881_s15, [#allocation4], %s3347_s30, %s3347_s30, %s3348_s16  }
0x1480   :  { %3340 = dma.done.wait [#allocation4], 512  }
0x1481   :  { %3341 = vsyncadd [#allocation4], 4294966784 }
0x1482   :  { %2563 = vsyncpa [#allocation3], 1 }
0x1483   :  { %2564 = vsyncpa [#allocation6], 1 }
0x1484   :  { %2565 = vsyncpa [#allocation9], 1 }
0x1485   :  { %2566 = vsyncpa [#allocation12], 1 }
0x1486   :  { %2567 = vsyncpa [#allocation4], 1 }

</bundles_post_ra>
